<compile_context>
chip_gen: v7x
topology: tpu7x:2x2x1
jax: 0.10.0
libtpu: 0.0.40
codegen_flags: <defaults>
</compile_context>

<pallas_src>
import jax
import jax.numpy as jnp
from jax.experimental import pallas as pl
from jax.experimental.pallas import tpu as pltpu

# ----------------------------------------------------------------------------
# Small, shape-consistent configuration (scaled down from the original:
# n_dim=1536, drug_num_dim=16, layers=[10240, 4096, 1]).
# ----------------------------------------------------------------------------
N_DIM = 128                    # per-drug feature width (original 1536)
DRUG_NUM_DIM = 16              # embedding width (same as original)
LAYERS = [512, 256, 1]         # (original [10240, 4096, 1])
BN_EPS = 1e-5
EMB_ROWS = 10                  # embedding table rows
ONE_HOT_W = 16                 # one-hot width for the raw drug index (0..15)
K_FEAT = 3 * N_DIM             # 384
K_IN = K_FEAT + ONE_HOT_W      # 400
K_PAD = 512                    # fused-input K padded to a lane-friendly 512
OUT_PAD = 128                  # lane-dense packed-head output width

KEY_ORDER = ("loewe", "ri_row", "ri_col", "classify")
KEY_INDEX = {k: i for i, k in enumerate(KEY_ORDER)}
CLASSIFY_HEAD = KEY_INDEX["classify"]


# ----------------------------------------------------------------------------
# One fused kernel: per grid step (= per task head) run the whole fused MLP.
# ----------------------------------------------------------------------------
def _encoder_heads_kernel(x_ref, wf_ref, s1_ref, t1_ref,
                          w2_ref, s2_ref, t2_ref,
                          wo_ref, bo_ref, o_ref):
    # x_ref  : [B, K_PAD]    bf16  (f1 | f2 | f3 | one_hot(idx) | 0-pad), shared
    # wf_ref : [K_PAD, H0]   bf16  per-head fused (input-Linear @ shared1) weight
    # s1_ref : [1, H0]       f32   BN1 scale (shared)
    # t1_ref : [1, H0]       f32   BN1 shift incl. fused biases (per head)
    # w2_ref : [H0, H1]      bf16  shared layer-2 weight (VMEM-resident)
    # s2/t2  : [1, H1]       f32   BN2 scale/shift incl. bias (shared)
    # wo_ref : [H1, OUT_PAD] bf16  all 4 heads packed in cols 0..3 (shared)
    # bo_ref : [1, OUT_PAD]  f32   packed head biases (shared)
    # o_ref  : [B, OUT_PAD]  f32   this head's padded output block
    z1 = jnp.dot(x_ref[...], wf_ref[...], preferred_element_type=jnp.float32)
    h1 = jnp.maximum(z1 * s1_ref[...] + t1_ref[...], 0.0)       # BN1 + ReLU

    z2 = jnp.dot(h1.astype(jnp.bfloat16), w2_ref[...],
                 preferred_element_type=jnp.float32)
    h2 = jnp.maximum(z2 * s2_ref[...] + t2_ref[...], 0.0)       # BN2 + ReLU

    out = jnp.dot(h2.astype(jnp.bfloat16), wo_ref[...],
                  preferred_element_type=jnp.float32) + bo_ref[...]
    o_ref[...] = out

    @pl.when(pl.program_id(0) == CLASSIFY_HEAD)
    def _():                                                    # sigmoid head
        o_ref[...] = 1.0 / (1.0 + jnp.exp(-out))


# ----------------------------------------------------------------------------
# Wrapper: single pallas_call producing all four task outputs at once.
# ----------------------------------------------------------------------------
@jax.jit
def encoder_forward_all(prepared, x_feat, drug_idx):
    B = x_feat.shape[0]
    h0, h1 = LAYERS[0], LAYERS[1]
    n_heads = len(KEY_ORDER)

    # Build the fused-input slab: bf16 [B, K_PAD] = [f1|f2|f3|one_hot|0-pad].
    one_hot = (jnp.clip(drug_idx, 0, ONE_HOT_W - 1)[:, None]
               == jnp.arange(ONE_HOT_W, dtype=jnp.int32)[None, :])
    x_in = jnp.concatenate(
        [x_feat.astype(jnp.bfloat16),
         one_hot.astype(jnp.bfloat16),
         jnp.zeros((B, K_PAD - K_IN), jnp.bfloat16)], axis=1)

    args = (x_in, prepared["wf"], prepared["s1"], prepared["t1"],
            prepared["w2"], prepared["s2"], prepared["t2"],
            prepared["wo"], prepared["bo"])

    def const_spec(shape):
        return pl.BlockSpec(shape, lambda h: (0,) * len(shape))

    flops = 2 * n_heads * B * (K_PAD * h0 + h0 * h1 + h1 * OUT_PAD)
    bytes_accessed = (sum(int(a.size) * a.dtype.itemsize for a in args)
                      + n_heads * B * OUT_PAD * 4)

    out_pad = pl.pallas_call(
        _encoder_heads_kernel,
        out_shape=jax.ShapeDtypeStruct((n_heads, B, OUT_PAD), jnp.float32),
        grid=(n_heads,),
        in_specs=[
            const_spec((B, K_PAD)),                                  # x_in
            pl.BlockSpec((None, K_PAD, h0), lambda h: (h, 0, 0)),    # wf (per head)
            const_spec((1, h0)),                                     # s1
            pl.BlockSpec((None, 1, h0), lambda h: (h, 0, 0)),        # t1 (per head)
            const_spec((h0, h1)),                                    # w2
            const_spec((1, h1)),                                     # s2
            const_spec((1, h1)),                                     # t2
            const_spec((h1, OUT_PAD)),                               # wo packed
            const_spec((1, OUT_PAD)),                                # bo packed
        ],
        out_specs=pl.BlockSpec((None, B, OUT_PAD), lambda h: (h, 0, 0)),
        compiler_params=pltpu.CompilerParams(
            dimension_semantics=("parallel",)),
        cost_estimate=pl.CostEstimate(flops=flops,
                                      transcendentals=B * OUT_PAD,
                                      bytes_accessed=bytes_accessed),
    )(*args)

    # Head h's real output is column h of its padded block -> [B, 4].
    return jnp.stack([out_pad[h, :, h] for h in range(n_heads)], axis=1)


def encoder_forward(prepared, x_feat, drug_idx, key_name):
    """Per-key view matching Encoder.forward(x, key) -> [B, 1]."""
    k = KEY_INDEX[key_name]
    return encoder_forward_all(prepared, x_feat, drug_idx)[:, k:k + 1]


# ----------------------------------------------------------------------------
# Parameter construction (deterministic, synthetic) and preparation.
# ----------------------------------------------------------------------------
def _dense(key, fan_in, fan_out, scale=0.02):
    kw, kb = jax.random.split(key)
    w = scale * jax.random.normal(kw, (fan_in, fan_out), jnp.float32)
    b = scale * jax.random.normal(kb, (fan_out,), jnp.float32)
    return w, b


def init_encoder_params(key):
    d_in = 2 * N_DIM + DRUG_NUM_DIM
    h0, h1, h_out = LAYERS[0], LAYERS[1], LAYERS[2]
    keys = jax.random.split(key, 16)
    params = {"emb": 0.1 * jax.random.normal(keys[0], (EMB_ROWS, DRUG_NUM_DIM),
                                             jnp.float32)}
    params["input"] = {}
    for i, name in enumerate(KEY_ORDER):
        params["input"][name] = _dense(keys[1 + i], d_in, h1)
    params["shared1"] = _dense(keys[5], h1, h0)
    params["bn1"] = {
        "gamma": 1.0 + 0.05 * jax.random.normal(keys[6], (h0,), jnp.float32),
        "beta": 0.05 * jax.random.normal(keys[7], (h0,), jnp.float32),
        "mean": 0.05 * jax.random.normal(keys[8], (h0,), jnp.float32),
        "var": jnp.abs(1.0 + 0.05 * jax.random.normal(keys[9], (h0,), jnp.float32)),
    }
    params["shared2"] = _dense(keys[10], h0, h1)
    params["bn2"] = {
        "gamma": 1.0 + 0.05 * jax.random.normal(keys[11], (h1,), jnp.float32),
        "beta": 0.05 * jax.random.normal(keys[12], (h1,), jnp.float32),
        "mean": 0.05 * jax.random.normal(keys[13], (h1,), jnp.float32),
        "var": jnp.abs(1.0 + 0.05 * jax.random.normal(keys[14], (h1,), jnp.float32)),
    }
    params["output"] = {}
    okeys = jax.random.split(keys[15], 4)
    for i, name in enumerate(KEY_ORDER):
        params["output"][name] = _dense(okeys[i], h1, h_out)
    return params


def prepare_params(params):
    """One-time prep: fuse input-Linear into shared1, fold BN(eval), bake the
    per-key feature mixing + embedding lookup (and its idx offset) into the
    fused weight, pack the four 1-wide heads into one lane-dense wo/bo."""
    n, h0, h1 = N_DIM, LAYERS[0], LAYERS[1]
    w1, b1 = params["shared1"]                       # [h1, h0], [h0]
    w2, b2 = params["shared2"]                       # [h0, h1], [h1]

    s1 = params["bn1"]["gamma"] / jnp.sqrt(params["bn1"]["var"] + BN_EPS)
    s2 = params["bn2"]["gamma"] / jnp.sqrt(params["bn2"]["var"] + BN_EPS)
    t2 = s2 * b2 + params["bn2"]["beta"] - s2 * params["bn2"]["mean"]

    # (f1, f2) mixing coefficients and idx offset per task head.
    alpha_beta = {"loewe": (0.5, 0.5), "ri_row": (1.0, 0.0),
                  "ri_col": (0.0, 1.0), "classify": (0.5, 0.5)}
    idx_off = {"loewe": 0, "ri_row": 1, "ri_col": 1, "classify": 0}

    raw = jnp.arange(ONE_HOT_W)
    wf_list, t1_list, wo_cols, bo_vals = [], [], [], []
    for name in KEY_ORDER:
        w_in, b_in = params["input"][name]           # [2n+16, h1], [h1]
        wf_base = w_in @ w1                          # exact fusion, f32 [2n+16, h0]
        a, b = alpha_beta[name]
        emb_rows = params["emb"][jnp.clip(raw - idx_off[name], 0, EMB_ROWS - 1)]
        wf_emb = emb_rows @ wf_base[2 * n:, :]       # [ONE_HOT_W, h0]
        wf_full = jnp.concatenate([
            a * wf_base[0:n, :],                     # f1 rows
            b * wf_base[0:n, :],                     # f2 rows
            wf_base[n:2 * n, :],                     # f3 rows
            wf_emb,                                  # one-hot rows
            jnp.zeros((K_PAD - K_IN, h0), jnp.float32)], axis=0)
        wf_list.append(wf_full.astype(jnp.bfloat16))

        b_fused = b_in @ w1 + b1
        t1_list.append(s1 * b_fused + params["bn1"]["beta"]
                       - s1 * params["bn1"]["mean"])

        w_o, b_o = params["output"][name]            # [h1, 1], [1]
        wo_cols.append(w_o[:, 0])
        bo_vals.append(b_o[0])

    wo = jnp.zeros((h1, OUT_PAD), jnp.float32)
    wo = wo.at[:, :len(KEY_ORDER)].set(jnp.stack(wo_cols, axis=1))
    bo = jnp.zeros((1, OUT_PAD), jnp.float32)
    bo = bo.at[0, :len(KEY_ORDER)].set(jnp.stack(bo_vals))

    return dict(
        wf=jnp.stack(wf_list, axis=0),               # [4, K_PAD, h0] bf16
        s1=s1[None, :],                              # [1, h0] f32
        t1=jnp.stack(t1_list)[:, None, :],           # [4, 1, h0] f32
        w2=w2.astype(jnp.bfloat16),                  # [h0, h1] bf16
        s2=s2[None, :], t2=t2[None, :],              # [1, h1] f32
        wo=wo.astype(jnp.bfloat16),                  # [h1, OUT_PAD] bf16
        bo=bo)                                       # [1, OUT_PAD] f32


# ----------------------------------------------------------------------------
# Pure-JAX f32 reference (mirrors the PyTorch module in eval mode).
# ----------------------------------------------------------------------------
def encoder_forward_ref(params, x_feat, drug_idx, key_name):
    n = N_DIM
    f1, f2, f3 = x_feat[:, 0:n], x_feat[:, n:2 * n], x_feat[:, 2 * n:3 * n]
    if key_name == "ri_row":
        x_input = jnp.concatenate([f1, f3, params["emb"][drug_idx - 1]], axis=1)
    elif key_name == "ri_col":
        x_input = jnp.concatenate([f2, f3, params["emb"][drug_idx - 1]], axis=1)
    else:
        x_input = jnp.concatenate([(f1 + f2) / 2.0, f3,
                                   params["emb"][drug_idx]], axis=1)
    w_in, b_in = params["input"][key_name]
    h = x_input @ w_in + b_in
    for (w, b), bn in ((params["shared1"], params["bn1"]),
                       (params["shared2"], params["bn2"])):
        z = h @ w + b
        z = bn["gamma"] * (z - bn["mean"]) / jnp.sqrt(bn["var"] + BN_EPS) + bn["beta"]
        h = jnp.maximum(z, 0.0)                      # Dropout = identity (eval)
    w_o, b_o = params["output"][key_name]
    out = h @ w_o + b_o
    if key_name == "classify":
        out = jax.nn.sigmoid(out)
    return out


if __name__ == "__main__":
    root = jax.random.PRNGKey(0)
    k_params, k_feat, k_idx = jax.random.split(root, 3)

    params = init_encoder_params(k_params)
    prepared = prepare_params(params)

    B = 8
    x_feat = jax.random.normal(k_feat, (B, 3 * N_DIM), jnp.float32)
    drug_idx = jax.random.randint(k_idx, (B,), 1, 10).astype(jnp.int32)

    all_out = jax.block_until_ready(encoder_forward_all(prepared, x_feat, drug_idx))
    assert all_out.shape == (B, len(KEY_ORDER))

    for name in KEY_ORDER:
        out = encoder_forward(prepared, x_feat, drug_idx, name)
        ref = encoder_forward_ref(params, x_feat, drug_idx, name)
        assert out.shape == (B, 1)
        # bf16 matmul operands / fused weights vs f32 reference -> loose tolerance
        assert jnp.allclose(out, ref, rtol=3e-2, atol=3e-2), name

    print("KERNEL_OK")
</pallas_src>

<mosaic_0001>
module attributes {stable_mosaic.version = 11 : i64} {
  func.func @_encoder_heads_kernel(%arg0: i32, %arg1: memref<8x512xbf16, #tpu.memory_space<vmem>>, %arg2: memref<1x512x512xbf16, #tpu.memory_space<vmem>>, %arg3: memref<1x512xf32, #tpu.memory_space<vmem>>, %arg4: memref<1x1x512xf32, #tpu.memory_space<vmem>>, %arg5: memref<512x256xbf16, #tpu.memory_space<vmem>>, %arg6: memref<1x256xf32, #tpu.memory_space<vmem>>, %arg7: memref<1x256xf32, #tpu.memory_space<vmem>>, %arg8: memref<256x128xbf16, #tpu.memory_space<vmem>>, %arg9: memref<1x128xf32, #tpu.memory_space<vmem>>, %arg10: memref<1x8x128xf32, #tpu.memory_space<vmem>>) attributes {dimension_semantics = [#tpu.dimension_semantics<parallel>], iteration_bounds = array<i64: 4>, scalar_prefetch = 0 : i64, scratch_operands = 0 : i64, tpu.core_type = #tpu.core_type<tc>, window_params = [{pipeline_mode = #tpu.pipeline_mode<synchronous>, transform_indices = @transform_0, window_bounds = array<i64: 8, 512>}, {transform_indices = @transform_1, window_bounds = array<i64: 1, 512, 512>}, {pipeline_mode = #tpu.pipeline_mode<synchronous>, transform_indices = @transform_2, window_bounds = array<i64: 1, 512>}, {transform_indices = @transform_3, window_bounds = array<i64: 1, 1, 512>}, {pipeline_mode = #tpu.pipeline_mode<synchronous>, transform_indices = @transform_4, window_bounds = array<i64: 512, 256>}, {pipeline_mode = #tpu.pipeline_mode<synchronous>, transform_indices = @transform_5, window_bounds = array<i64: 1, 256>}, {pipeline_mode = #tpu.pipeline_mode<synchronous>, transform_indices = @transform_6, window_bounds = array<i64: 1, 256>}, {pipeline_mode = #tpu.pipeline_mode<synchronous>, transform_indices = @transform_7, window_bounds = array<i64: 256, 128>}, {pipeline_mode = #tpu.pipeline_mode<synchronous>, transform_indices = @transform_8, window_bounds = array<i64: 1, 128>}, {transform_indices = @transform_9, window_bounds = array<i64: 1, 8, 128>}]} {
    %c0 = arith.constant 0 : index
    %c0_0 = arith.constant 0 : index
    %0 = vector.load %arg1[%c0, %c0_0] : memref<8x512xbf16, #tpu.memory_space<vmem>>, vector<8x512xbf16>
    %c0_1 = arith.constant 0 : index
    %c0_2 = arith.constant 0 : index
    %c0_3 = arith.constant 0 : index
    %1 = vector.load %arg2[%c0_1, %c0_2, %c0_3] : memref<1x512x512xbf16, #tpu.memory_space<vmem>>, vector<1x512x512xbf16>
    %2 = vector.shape_cast %1 : vector<1x512x512xbf16> to vector<512x512xbf16>
    %cst = arith.constant dense<0.000000e+00> : vector<8x512xf32>
    %3 = tpu.matmul %0, %2, %cst {dimension_numbers = #tpu.dot_dimension_numbers<[1], [0], [0], [1], [0, 0, 1, 1], [], []>} : vector<8x512xbf16>, vector<512x512xbf16>, vector<8x512xf32> -> vector<8x512xf32>
    %c0_4 = arith.constant 0 : index
    %c0_5 = arith.constant 0 : index
    %4 = vector.load %arg3[%c0_4, %c0_5] : memref<1x512xf32, #tpu.memory_space<vmem>>, vector<1x512xf32>
    %5 = vector.broadcast %4 : vector<1x512xf32> to vector<8x512xf32>
    %6 = arith.mulf %3, %5 : vector<8x512xf32>
    %c0_6 = arith.constant 0 : index
    %c0_7 = arith.constant 0 : index
    %c0_8 = arith.constant 0 : index
    %7 = vector.load %arg4[%c0_6, %c0_7, %c0_8] : memref<1x1x512xf32, #tpu.memory_space<vmem>>, vector<1x1x512xf32>
    %8 = vector.shape_cast %7 : vector<1x1x512xf32> to vector<1x512xf32>
    %9 = vector.broadcast %8 : vector<1x512xf32> to vector<8x512xf32>
    %10 = arith.addf %6, %9 : vector<8x512xf32>
    %cst_9 = arith.constant 0.000000e+00 : f32
    %11 = vector.broadcast %cst_9 : f32 to vector<8x512xf32>
    %12 = arith.maximumf %10, %11 : vector<8x512xf32>
    %13 = arith.truncf %12 : vector<8x512xf32> to vector<8x512xbf16>
    %c0_10 = arith.constant 0 : index
    %c0_11 = arith.constant 0 : index
    %14 = vector.load %arg5[%c0_10, %c0_11] : memref<512x256xbf16, #tpu.memory_space<vmem>>, vector<512x256xbf16>
    %cst_12 = arith.constant dense<0.000000e+00> : vector<8x256xf32>
    %15 = tpu.matmul %13, %14, %cst_12 {dimension_numbers = #tpu.dot_dimension_numbers<[1], [0], [0], [1], [0, 0, 1, 1], [], []>} : vector<8x512xbf16>, vector<512x256xbf16>, vector<8x256xf32> -> vector<8x256xf32>
    %c0_13 = arith.constant 0 : index
    %c0_14 = arith.constant 0 : index
    %16 = vector.load %arg6[%c0_13, %c0_14] : memref<1x256xf32, #tpu.memory_space<vmem>>, vector<1x256xf32>
    %17 = vector.broadcast %16 : vector<1x256xf32> to vector<8x256xf32>
    %18 = arith.mulf %15, %17 : vector<8x256xf32>
    %c0_15 = arith.constant 0 : index
    %c0_16 = arith.constant 0 : index
    %19 = vector.load %arg7[%c0_15, %c0_16] : memref<1x256xf32, #tpu.memory_space<vmem>>, vector<1x256xf32>
    %20 = vector.broadcast %19 : vector<1x256xf32> to vector<8x256xf32>
    %21 = arith.addf %18, %20 : vector<8x256xf32>
    %cst_17 = arith.constant 0.000000e+00 : f32
    %22 = vector.broadcast %cst_17 : f32 to vector<8x256xf32>
    %23 = arith.maximumf %21, %22 : vector<8x256xf32>
    %24 = arith.truncf %23 : vector<8x256xf32> to vector<8x256xbf16>
    %c0_18 = arith.constant 0 : index
    %c0_19 = arith.constant 0 : index
    %25 = vector.load %arg8[%c0_18, %c0_19] : memref<256x128xbf16, #tpu.memory_space<vmem>>, vector<256x128xbf16>
    %cst_20 = arith.constant dense<0.000000e+00> : vector<8x128xf32>
    %26 = tpu.matmul %24, %25, %cst_20 {dimension_numbers = #tpu.dot_dimension_numbers<[1], [0], [0], [1], [0, 0, 1, 1], [], []>} : vector<8x256xbf16>, vector<256x128xbf16>, vector<8x128xf32> -> vector<8x128xf32>
    %c0_21 = arith.constant 0 : index
    %c0_22 = arith.constant 0 : index
    %27 = vector.load %arg9[%c0_21, %c0_22] : memref<1x128xf32, #tpu.memory_space<vmem>>, vector<1x128xf32>
    %28 = vector.broadcast %27 : vector<1x128xf32> to vector<8x128xf32>
    %29 = arith.addf %26, %28 : vector<8x128xf32>
    %c0_23 = arith.constant 0 : index
    %c0_24 = arith.constant 0 : index
    %c0_25 = arith.constant 0 : index
    %30 = vector.load %arg10[%c0_23, %c0_24, %c0_25] : memref<1x8x128xf32, #tpu.memory_space<vmem>>, vector<1x8x128xf32>
    %31 = vector.shape_cast %30 : vector<1x8x128xf32> to vector<8x128xf32>
    %32 = vector.shape_cast %29 : vector<8x128xf32> to vector<1x8x128xf32>
    tpu.vector_store %arg10[%c0_23, %c0_24, %c0_25], %32 {strides = array<i32>} : memref<1x8x128xf32, #tpu.memory_space<vmem>>, vector<1x8x128xf32>,
    %c3_i32 = arith.constant 3 : i32
    %33 = arith.cmpi eq, %arg0, %c3_i32 : i32
    %34 = arith.extui %33 : i1 to i32
    %c0_i32 = arith.constant 0 : i32
    %35 = arith.cmpi ne, %34, %c0_i32 : i32
    scf.if %35 {
      %cst_26 = arith.constant 0.000000e+00 : f32
      %36 = vector.broadcast %cst_26 : f32 to vector<8x128xf32>
      %37 = arith.subf %36, %29 : vector<8x128xf32>
      %38 = math.exp %37 : vector<8x128xf32>
      %cst_27 = arith.constant 1.000000e+00 : f32
      %39 = vector.broadcast %cst_27 : f32 to vector<8x128xf32>
      %40 = arith.addf %39, %38 : vector<8x128xf32>
      %cst_28 = arith.constant 1.000000e+00 : f32
      %41 = vector.broadcast %cst_28 : f32 to vector<8x128xf32>
      %42 = arith.divf %41, %40 : vector<8x128xf32>
      %c0_29 = arith.constant 0 : index
      %c0_30 = arith.constant 0 : index
      %c0_31 = arith.constant 0 : index
      %43 = vector.load %arg10[%c0_29, %c0_30, %c0_31] : memref<1x8x128xf32, #tpu.memory_space<vmem>>, vector<1x8x128xf32>
      %44 = vector.shape_cast %43 : vector<1x8x128xf32> to vector<8x128xf32>
      %45 = vector.shape_cast %42 : vector<8x128xf32> to vector<1x8x128xf32>
      tpu.vector_store %arg10[%c0_29, %c0_30, %c0_31], %45 {strides = array<i32>} : memref<1x8x128xf32, #tpu.memory_space<vmem>>, vector<1x8x128xf32>,
    } else {
    }
    return
  }
  func.func @transform_0(%arg0: i32) -> (i32, i32) {
    %c0_i32 = arith.constant 0 : i32
    %c0_i32_0 = arith.constant 0 : i32
    %c0_i32_1 = arith.constant 0 : i32
    return %c0_i32, %c0_i32_0 : i32, i32
  }
  func.func @transform_1(%arg0: i32) -> (i32, i32, i32) {
    %c0_i32 = arith.constant 0 : i32
    %c0_i32_0 = arith.constant 0 : i32
    %c0_i32_1 = arith.constant 0 : i32
    return %arg0, %c0_i32, %c0_i32_0 : i32, i32, i32
  }
  func.func @transform_2(%arg0: i32) -> (i32, i32) {
    %c0_i32 = arith.constant 0 : i32
    %c0_i32_0 = arith.constant 0 : i32
    %c0_i32_1 = arith.constant 0 : i32
    return %c0_i32, %c0_i32_0 : i32, i32
  }
  func.func @transform_3(%arg0: i32) -> (i32, i32, i32) {
    %c0_i32 = arith.constant 0 : i32
    %c0_i32_0 = arith.constant 0 : i32
    %c0_i32_1 = arith.constant 0 : i32
    return %arg0, %c0_i32, %c0_i32_0 : i32, i32, i32
  }
  func.func @transform_4(%arg0: i32) -> (i32, i32) {
    %c0_i32 = arith.constant 0 : i32
    %c0_i32_0 = arith.constant 0 : i32
    %c0_i32_1 = arith.constant 0 : i32
    return %c0_i32, %c0_i32_0 : i32, i32
  }
  func.func @transform_5(%arg0: i32) -> (i32, i32) {
    %c0_i32 = arith.constant 0 : i32
    %c0_i32_0 = arith.constant 0 : i32
    %c0_i32_1 = arith.constant 0 : i32
    return %c0_i32, %c0_i32_0 : i32, i32
  }
  func.func @transform_6(%arg0: i32) -> (i32, i32) {
    %c0_i32 = arith.constant 0 : i32
    %c0_i32_0 = arith.constant 0 : i32
    %c0_i32_1 = arith.constant 0 : i32
    return %c0_i32, %c0_i32_0 : i32, i32
  }
  func.func @transform_7(%arg0: i32) -> (i32, i32) {
    %c0_i32 = arith.constant 0 : i32
    %c0_i32_0 = arith.constant 0 : i32
    %c0_i32_1 = arith.constant 0 : i32
    return %c0_i32, %c0_i32_0 : i32, i32
  }
  func.func @transform_8(%arg0: i32) -> (i32, i32) {
    %c0_i32 = arith.constant 0 : i32
    %c0_i32_0 = arith.constant 0 : i32
    %c0_i32_1 = arith.constant 0 : i32
    return %c0_i32, %c0_i32_0 : i32, i32
  }
  func.func @transform_9(%arg0: i32) -> (i32, i32, i32) {
    %c0_i32 = arith.constant 0 : i32
    %c0_i32_0 = arith.constant 0 : i32
    %c0_i32_1 = arith.constant 0 : i32
    return %arg0, %c0_i32, %c0_i32_0 : i32, i32, i32
  }
}

</mosaic_0001>

<bundles_post_ra>
// kernel: encoder_forward_all.1
= control target key start
LH: loop header
LB: loop body
LE: loop exit
PB: predicated region body
PF: predicated region fallthrough
CT: control target
= control target key end

     0   :  { %s3836_s0 = inlined_call_operand.vmem [shape: bf16[8,512], index: 0, kind: input, shape index: {}]   ;;  %s3837_s1 = inlined_call_operand.hbm [shape: bf16[4,512,512], index: 1, kind: input, shape index: {}]   ;;  %s3838_s2 = inlined_call_operand.hbm [shape: f32[1,512], index: 2, kind: input, shape index: {}]   ;;  %s3839_s3 = inlined_call_operand.hbm [shape: f32[4,1,512], index: 3, kind: input, shape index: {}]   ;;  %s3840_s4 = inlined_call_operand.hbm [shape: bf16[512,256], index: 4, kind: input, shape index: {}]   ;;  %s3841_s5 = inlined_call_operand.hbm [shape: f32[1,256], index: 5, kind: input, shape index: {}]   ;;  %s3842_s6 = inlined_call_operand.hbm [shape: f32[1,256], index: 6, kind: input, shape index: {}]   ;;  %s3843_s7 = inlined_call_operand.hbm [shape: bf16[256,128], index: 7, kind: input, shape index: {}]   ;;  %s3844_s8 = inlined_call_operand.hbm [shape: f32[1,128], index: 8, kind: input, shape index: {}]   ;;  %s3845_s9 = inlined_call_operand.vmem [shape: f32[4,8,128], index: 9, kind: output, shape index: {}]  }
   0x1   :  { %3857 = sst [smem:[#allocation22_spill]] %s3837_s1 }
   0x2   :  { %3858 = sst [smem:[#allocation23_spill]] %s3838_s2 }
   0x3   :  { %3859 = sst [smem:[#allocation24_spill]] %s3841_s5 }
   0x4   :  { %3860 = sst [smem:[#allocation25_spill]] %s3843_s7 }
   0x5   :  { %3861 = sst [smem:[#allocation26_spill]] %s3845_s9 }
   0x6   :  { %14 = vsyncpa [#allocation3], 0 }
   0x7   :  { %16 = vsyncpa [#allocation3 + $0x1], 0 }
   0x8   :  { %17 = vsyncpa [#allocation5], 0 }
   0x9   :  { %18 = vsyncpa [#allocation9], 0 }
   0xa   :  { %19 = vsyncpa [#allocation12], 0  ;;  %s3347_s30 = smov 0   ;;  %s3349_s10 = smov 0  }
   0xb   :  { %s3351_s11 = smov 0   ;;  %s3353_s12 = smov 0  }
   0xc LB: > { %s3283_s13 = smov [#allocation4]   ;;  %s3368_s15 = sadd.s32 4294967295, %s3281_s12   ;;  %s3281_s12 = sphi %s3353_s12, %s3890_s12   ;;  %s3277_s11 = sphi %s3351_s11, %s3894_s11   ;;  %s3273_s10 = sphi %s3349_s10, %s3893_s10   ;;  %s3269_s30 = sphi %s3347_s30, %s3892_s30  }
   0xd   : > { %s271_s14 = sshll.u32 %s3283_s13, 4  ;;  %p2302_p0 = scmp.ge.s32.totalorder %s3281_s12, 1  ;;  %s272_s14 = int_to_ptr.vmem [resolvable:$true] %s271_s14 }
   0xe   : > { %p3846_p1 = scmp.eq.s32.totalorder %s3368_s15, 0  ;;  %p255_p2 = scmp.lt.s32.totalorder %s3281_s12, 5 }
   0xf   : > { %s3284_s17 = smov [#allocation8]   ;;  %s3285_s19 = smov [#allocation11]  }
  0x10   : > { %p3373_p3 = pnand %p2302_p0, %p255_p2  ;;  %s295_s18 = sshll.u32 %s3284_s17, 4  ;;  %s3379_s18 = int_to_ptr.vmem [resolvable:$true] %s295_s18 }
  0x11   : > { %s316_s20 = sshll.u32 %s3285_s19, 4  ;;  %s3864_s2 = sld [smem:[#allocation23_spill]]  ;;  %s3387_s20 = int_to_ptr.vmem [resolvable:$true] %s316_s20 }
  0x12   : > { %s3862_s16 = scalar_select %p3373_p3, 1, 0 }
  0x13   : > { %p2604_p4 = pneg %p3373_p3 }
  0x15   : > { %p3383_p5 = pnand %p2604_p4, %p3846_p1 }
  0x17   : > { %s3863_s21 = scalar_select %p3383_p5, 1, 0 }
  0x18   : > { %s2999_s24 = scalar_lea.hbm %s3864_s2, 64  ;;  %p3397_p7 = pneg %p3383_p5 }
  0x19   : > { %p3000_p6 = scmp.ne.s32.totalorder %s3864_s2, %s2999_s24  ;;  %p3006_p10 = scmp.lt.u32.totalorder %s2999_s24, %s3864_s2 }
  0x1b   : > { %p3002_p8 = pnand %p3397_p7, %p3000_p6 }
  0x1d   : > { %p3003_p9 = pneg %p3002_p8 }
  0x1f   : > { %p3008_p11 = pnand %p3006_p10, %p3003_p9 }
  0x21   : > { %3011 = shalt.err (!%p3008_p11)
}
  0x22   : > { %s3012_s13 = scalar_lea.vmem %s272_s14, 64  ;;  %p3020_p2 = scmp.lt.s32.totalorder %s272_s14, %s272_s14 }
  0x23   : > { %p3013_p12 = scmp.ne.s32.totalorder %s272_s14, %s3012_s13  ;;  %p3021_p4 = scmp.lt.s32.totalorder %s3012_s13, %s3012_s13 }
  0x25   : > { %p3015_p13 = pnand %p3013_p12, %p3397_p7  ;;  %p3022_p1 = por %p3021_p4, %p3020_p2 }
  0x27   : > { %p3016_p0 = pneg %p3015_p13 }
  0x29   : > { %p3023_p3 = pnand %p3022_p1, %p3016_p0 }
  0x2b   : > { %3026 = shalt.err (!%p3023_p3)
}
  0x2c   : > { %2607 = dma.hbm_to_vmem [thread:$0]  (!%p3383_p5), %s3864_s2, 64, %s272_s14, [#allocation5]  }
  0x2d   : > { %s3866_s5 = sld [smem:[#allocation24_spill]] }
  0x33   : > { %s3027_s24 = scalar_lea.hbm %s3866_s5, 32 }
  0x34   : > { %p3028_p6 = scmp.ne.s32.totalorder %s3866_s5, %s3027_s24  ;;  %p3034_p1 = scmp.lt.u32.totalorder %s3027_s24, %s3866_s5 }
  0x36   : > { %p3030_p8 = pnand %p3028_p6, %p3397_p7 }
  0x38   : > { %p3031_p9 = pneg %p3030_p8 }
  0x3a   : > { %p3036_p3 = pnand %p3034_p1, %p3031_p9 }
  0x3c   : > { %3039 = shalt.err (!%p3036_p3)
}
  0x3d   : > { %s3040_s14 = scalar_lea.vmem %s3379_s18, 32  ;;  %p3048_p13 = scmp.lt.s32.totalorder %s3379_s18, %s3379_s18 }
  0x3e   : > { %p3041_p10 = scmp.ne.s32.totalorder %s3379_s18, %s3040_s14  ;;  %p3049_p0 = scmp.lt.s32.totalorder %s3040_s14, %s3040_s14 }
  0x40   : > { %p3043_p11 = pnand %p3041_p10, %p3397_p7  ;;  %p3050_p2 = por %p3049_p0, %p3048_p13 }
  0x42   : > { %p3044_p12 = pneg %p3043_p11 }
  0x44   : > { %p3051_p4 = pnand %p3050_p2, %p3044_p12 }
  0x46   : > { %3054 = shalt.err (!%p3051_p4)
}
  0x47   : > { %2613 = dma.hbm_to_vmem [thread:$0]  (!%p3383_p5), %s3866_s5, 32, %s3379_s18, [#allocation9]  }
  0x48   : > { %s3867_s7 = sld [smem:[#allocation25_spill]] }
  0x4e   : > { %s3055_s23 = scalar_lea.hbm %s3867_s7, 2048 }
  0x4f   : > { %p3056_p6 = scmp.ne.s32.totalorder %s3867_s7, %s3055_s23  ;;  %p3062_p1 = scmp.lt.u32.totalorder %s3055_s23, %s3867_s7 }
  0x51   : > { %p3058_p8 = pnand %p3056_p6, %p3397_p7 }
  0x53   : > { %p3059_p9 = pneg %p3058_p8 }
  0x55   : > { %p3064_p3 = pnand %p3062_p1, %p3059_p9 }
  0x57   : > { %3067 = shalt.err (!%p3064_p3)
}
  0x58   : > { %s3068_s18 = scalar_lea.vmem %s3387_s20, 2048  ;;  %p3076_p13 = scmp.lt.s32.totalorder %s3387_s20, %s3387_s20 }
  0x59   : > { %p3069_p10 = scmp.ne.s32.totalorder %s3387_s20, %s3068_s18  ;;  %p3077_p0 = scmp.lt.s32.totalorder %s3068_s18, %s3068_s18 }
  0x5b   : > { %p3071_p11 = pnand %p3069_p10, %p3397_p7  ;;  %p3078_p2 = por %p3077_p0, %p3076_p13 }
  0x5d   : > { %p3072_p12 = pneg %p3071_p11 }
  0x5f   : > { %p3079_p4 = pnand %p3078_p2, %p3072_p12 }
  0x61   : > { %3082 = shalt.err (!%p3079_p4)
}
  0x62   : > { %s3286_s29 = smov 64   ;;  %s3287_s14 = smov 4  }
  0x63   : > { %2619 = dma.hbm_to_vmem [thread:$0]  (!%p3383_p5), %s3867_s7, 2048, %s3387_s20, [#allocation12], %s3286_s29, %s3286_s29, %s3287_s14  }
  0x64   : > { %s3460_s19 = sadd.s32 1, %s3281_s12   ;;  %s53_s23 = sadd.s32 1, %s3277_s11 }
  0x65   : > { %3868 = sst [smem:[#allocation20_spill]] %s3460_s19  ;;  %s50_s22 = ssub.s32 %s3281_s12, %s3460_s19 }
  0x66   : > { %p51_p6 = scmp.eq.s32.totalorder %s50_s22, 0  ;;  %p60_p8 = scmp.ne.s32.totalorder %s3277_s11, %s3273_s10 }
  0x67   : > { %p61_p9 = scmp.eq.s32.totalorder %s3281_s12, 0  ;;  %p66_p1 = scmp.ne.s32.totalorder %s3273_s10, %s3269_s30 }
  0x68   : > { %s3471_s24 = scalar_select %p51_p6, %s3277_s11, %s53_s23  }
  0x69   : > { %p62_p3 = por %p61_p9, %p60_p8  ;;  %p3870_p10 = scmp.eq.s32.totalorder %s3368_s15, 0 }
  0x6a   : > { %3869 = sst [smem:[#allocation21_spill]] %s3471_s24  ;;  %p2636_p12 = scmp.lt.s32.totalorder %s3281_s12, 4 }
  0x6b   : > { %p3475_p11 = por %p3870_p10, %p66_p1  ;;  %s341_s26 = sand.u32 1, %s3281_s12  }
  0x6c   : > { %s3848_s20 = sand.u32 1, %s3277_s11   ;;  %s2542_s18 = sshll.u32 %s3281_s12, 14 }
  0x6d   : > { %s3871_s25 = scalar_select %p3475_p11, 1, 0 }
  0x6e   : > { %s2310_s28 = sshll.u32 %s3848_s20, 10  ;;  %s3872_s1 = sld [smem:[#allocation22_spill]] }
  0x6f   : > { %s345_s30 = scalar_lea.vmem [#allocation2], %s2310_s28  ;;  %p3490_p13 = pnand %p2636_p12, %p62_p3 }
  0x70   : > { %s352_s17 = sshll.u32 %s345_s30, 4  ;;  %s3496_s23 = scalar_lea.sflag [#allocation3], %s341_s26  ;;  %s3494_s17 = int_to_ptr.vmem [resolvable:$true] %s352_s17 }
  0x71   : > { %s3873_s22 = scalar_select %p3490_p13, 1, 0 }
  0x72   : > { %p3852_p2 = pneg %p3490_p13 }
  0x74   : > { %s3488_s13 = scalar_lea.hbm %s3872_s1, %s2542_s18  ;;  %s3088_s29 = scalar_lea.hbm %s3872_s1, 65536 }
  0x75   : > { %s3083_s20 = scalar_lea.hbm %s3488_s13, 16384  ;;  %p3089_p8 = scmp.lt.u32.totalorder %s3488_s13, %s3872_s1 }
  0x76   : > { %p3084_p0 = scmp.ne.s32.totalorder %s3488_s13, %s3083_s20  ;;  %p3090_p9 = scmp.lt.u32.totalorder %s3088_s29, %s3083_s20 }
  0x77   : > { %p3092_p3 = scmp.lt.u32.totalorder %s3083_s20, %s3488_s13 }
  0x78   : > { %p3086_p4 = pnand %p3852_p2, %p3084_p0  ;;  %p3091_p1 = por %p3090_p9, %p3089_p8 }
  0x7a   : > { %p3087_p6 = pneg %p3086_p4  ;;  %p3093_p10 = por %p3092_p3, %p3091_p1 }
  0x7c   : > { %p3094_p12 = pnand %p3093_p10, %p3087_p6 }
  0x7e   : > { %3097 = shalt.err (!%p3094_p12)
}
  0x7f   : > { %s3098_s26 = scalar_lea.vmem %s3494_s17, 16384  ;;  %s3288_s28 = smov [#allocation2]  }
  0x80   : > { %p3099_p0 = scmp.ne.s32.totalorder %s3494_s17, %s3098_s26  ;;  %s3103_s18 = sshll.u32 %s3288_s28, 4  ;;  %s3104_s18 = int_to_ptr.vmem [resolvable:$false] %s3103_s18 }
  0x81   : > { %s3105_s14 = scalar_lea.vmem %s3104_s18, 32768  ;;  %p3106_p5 = scmp.lt.s32.totalorder %s3494_s17, %s3104_s18 }
  0x82   : > { %p3101_p4 = pnand %p3099_p0, %p3852_p2  ;;  %p3107_p8 = scmp.lt.s32.totalorder %s3105_s14, %s3098_s26 }
  0x84   : > { %p3102_p11 = pneg %p3101_p4  ;;  %p3108_p9 = por %p3107_p8, %p3106_p5 }
  0x86   : > { %p3109_p1 = pnand %p3108_p9, %p3102_p11 }
  0x88   : > { %3112 = shalt.err (!%p3109_p1)
}
  0x89   : > { %s3289_s20 = smov 256   ;;  %s3290_s29 = smov 16  }
  0x8a   : > { %2626 = dma.hbm_to_vmem [thread:$0]  (!%p3490_p13), %s3488_s13, 16384, %s3494_s17, %s3496_s23, %s3289_s20, %s3289_s20, %s3290_s29  }
  0x8b   : > { %s3291_s30 = smov [#allocation7]   ;;  %s3113_s18 = scalar_lea.hbm %s3840_s4, 8192 }
  0x8c   : > { %s281_s1 = sshll.u32 %s3291_s30, 4  ;;  %p3114_p5 = scmp.ne.s32.totalorder %s3840_s4, %s3113_s18  ;;  %s282_s1 = int_to_ptr.vmem [resolvable:$true] %s281_s1 }
  0x8d   : > { %p3120_p3 = scmp.lt.u32.totalorder %s3113_s18, %s3840_s4 }
  0x8e   : > { %p3116_p11 = pnand %p3114_p5, %p3397_p7 }
  0x90   : > { %p3117_p6 = pneg %p3116_p11 }
  0x92   : > { %p3122_p10 = pnand %p3120_p3, %p3117_p6 }
  0x94   : > { %3125 = shalt.err (!%p3122_p10)
}
  0x95   : > { %s3126_s13 = scalar_lea.vmem %s282_s1, 8192  ;;  %p3134_p8 = scmp.lt.s32.totalorder %s282_s1, %s282_s1 }
  0x96   : > { %p3127_p12 = scmp.ne.s32.totalorder %s282_s1, %s3126_s13  ;;  %p3135_p9 = scmp.lt.s32.totalorder %s3126_s13, %s3126_s13 }
  0x98   : > { %p3129_p0 = pnand %p3127_p12, %p3397_p7  ;;  %p3136_p1 = por %p3135_p9, %p3134_p8 }
  0x9a   : > { %p3130_p4 = pneg %p3129_p0 }
  0x9c   : > { %p3137_p2 = pnand %p3136_p1, %p3130_p4 }
  0x9e   : > { %3140 = shalt.err (!%p3137_p2)
}
  0x9f   : > { %s3292_s2 = smov 128   ;;  %s3293_s17 = smov 8  }
  0xa0   : > { %p3874_p5 = scmp.ne.s32.totalorder %s3863_s21, 0  ;;  %s3294_s20 = smov [#allocation10]  }
  0xa1   : > { %s306_s29 = sshll.u32 %s3294_s20, 4  ;;  %s3295_s30 = smov [#allocation13]   ;;  %s307_s29 = int_to_ptr.vmem [resolvable:$true] %s306_s29 }
  0xa2   : > { %2610 = dma.hbm_to_vmem [thread:$0]  (!%p3874_p5), %s3840_s4, 8192, %s282_s1, [#allocation5], %s3292_s2, %s3292_s2, %s3293_s17  }
  0xa3   : > { %s330_s28 = sshll.u32 %s3295_s30, 4  ;;  %s3141_s14 = scalar_lea.hbm %s3842_s6, 32  ;;  %s331_s28 = int_to_ptr.vmem [resolvable:$true] %s330_s28 }
  0xa4   : > { %p3142_p2 = scmp.ne.s32.totalorder %s3842_s6, %s3141_s14  ;;  %p3148_p3 = scmp.lt.u32.totalorder %s3141_s14, %s3842_s6 }
  0xa6   : > { %p3144_p11 = pnand %p3142_p2, %p3397_p7 }
  0xa8   : > { %p3145_p6 = pneg %p3144_p11 }
  0xaa   : > { %p3150_p10 = pnand %p3148_p3, %p3145_p6 }
  0xac   : > { %3153 = shalt.err (!%p3150_p10)
}
  0xad   : > { %s3154_s1 = scalar_lea.vmem %s307_s29, 32  ;;  %p3162_p8 = scmp.lt.s32.totalorder %s307_s29, %s307_s29 }
  0xae   : > { %p3155_p12 = scmp.ne.s32.totalorder %s307_s29, %s3154_s1  ;;  %p3163_p9 = scmp.lt.s32.totalorder %s3154_s1, %s3154_s1 }
  0xb0   : > { %p3157_p0 = pnand %p3155_p12, %p3397_p7  ;;  %p3164_p1 = por %p3163_p9, %p3162_p8 }
  0xb2   : > { %p3158_p4 = pneg %p3157_p0 }
  0xb4   : > { %p3165_p13 = pnand %p3164_p1, %p3158_p4 }
  0xb6   : > { %3168 = shalt.err (!%p3165_p13)
}
  0xb7   : > { %2616 = dma.hbm_to_vmem [thread:$0]  (!%p3874_p5), %s3842_s6, 32, %s307_s29, [#allocation9]  }
  0xb8   : > { %s3875_s9 = sand.u32 1, %s3277_s11   ;;  %s3169_s7 = scalar_lea.hbm %s3844_s8, 16 }
  0xb9   : > { %s2313_s19 = sshll.u32 %s3875_s9, 2  ;;  %p3170_p2 = scmp.ne.s32.totalorder %s3844_s8, %s3169_s7 }
  0xba   : > { %p3176_p6 = scmp.lt.u32.totalorder %s3169_s7, %s3844_s8 }
  0xbb   : > { %p3172_p13 = pnand %p3170_p2, %p3397_p7 }
  0xbd   : > { %p3173_p11 = pneg %p3172_p13 }
  0xbf   : > { %p3178_p3 = pnand %p3176_p6, %p3173_p11 }
  0xc1   : > { %3181 = shalt.err (!%p3178_p3)
}
  0xc2   : > { %s3182_s29 = scalar_lea.vmem %s331_s28, 16  ;;  %s3189_s14 = scalar_lea.vmem %s331_s28, 32 }
  0xc3   : > { %p3183_p10 = scmp.ne.s32.totalorder %s331_s28, %s3182_s29  ;;  %p3190_p4 = scmp.lt.s32.totalorder %s331_s28, %s331_s28 }
  0xc4   : > { %p3191_p8 = scmp.lt.s32.totalorder %s3189_s14, %s3182_s29 }
  0xc5   : > { %p3185_p12 = pnand %p3183_p10, %p3397_p7 }
  0xc6   : > { %p3192_p9 = por %p3191_p8, %p3190_p4 }
  0xc7   : > { %p3186_p0 = pneg %p3185_p12 }
  0xc9   : > { %p3193_p1 = pnand %p3192_p9, %p3186_p0 }
  0xcb   : > { %3196 = shalt.err (!%p3193_p1)
}
  0xcc   : > { %2622 = dma.hbm_to_vmem [thread:$0]  (!%p3874_p5), %s3844_s8, 16, %s331_s28, [#allocation12]  }
  0xcd   : > { %s2543_s24 = sshll.u32 %s3281_s12, 6  ;;  %s366_s17 = scalar_lea.vmem [#allocation6], %s2313_s19 }
  0xce   : > { %s3584_s27 = scalar_lea.hbm %s3839_s3, %s2543_s24  ;;  %s374_s5 = sshll.u32 %s366_s17, 4  ;;  %s375_s5 = int_to_ptr.vmem [resolvable:$true] %s374_s5 }
  0xcf   : > { %s3197_s21 = scalar_lea.hbm %s3584_s27, 64  ;;  %p3876_p2 = scmp.ne.s32.totalorder %s3873_s22, 0 }
  0xd0   : > { %p3198_p7 = scmp.ne.s32.totalorder %s3584_s27, %s3197_s21  ;;  %s3202_s7 = scalar_lea.hbm %s3839_s3, 256 }
  0xd1   : > { %p3877_p13 = pneg %p3876_p2  ;;  %p3203_p5 = scmp.lt.u32.totalorder %s3584_s27, %s3839_s3 }
  0xd2   : > { %p3204_p3 = scmp.lt.u32.totalorder %s3202_s7, %s3197_s21  ;;  %p3206_p12 = scmp.lt.u32.totalorder %s3197_s21, %s3584_s27 }
  0xd3   : > { %p3200_p11 = pnand %p3198_p7, %p3877_p13 }
  0xd4   : > { %p3205_p10 = por %p3204_p3, %p3203_p5 }
  0xd5   : > { %p3201_p6 = pneg %p3200_p11 }
  0xd6   : > { %p3207_p0 = por %p3206_p12, %p3205_p10 }
  0xd8   : > { %p3208_p4 = pnand %p3207_p0, %p3201_p6 }
  0xda   : > { %3211 = shalt.err (!%p3208_p4)
}
  0xdb   : > { %s3212_s19 = scalar_lea.vmem %s375_s5, 64  ;;  %p3878_p9 = pmov %p3877_p13 }
  0xdc   : > { %p3213_p8 = scmp.ne.s32.totalorder %s375_s5, %s3212_s19  ;;  %s3296_s18 = smov [#allocation6]  }
  0xdd   : > { %s3217_s26 = sshll.u32 %s3296_s18, 4  ;;  %s3218_s26 = int_to_ptr.vmem [resolvable:$false] %s3217_s26 }
  0xde   : > { %p3215_p1 = pnand %p3213_p8, %p3878_p9  ;;  %s3219_s29 = scalar_lea.vmem %s3218_s26, 128 }
  0xdf   : > { %p3220_p13 = scmp.lt.s32.totalorder %s375_s5, %s3218_s26  ;;  %p3221_p11 = scmp.lt.s32.totalorder %s3219_s29, %s3212_s19 }
  0xe0   : > { %p3216_p7 = pneg %p3215_p1 }
  0xe1   : > { %p3222_p3 = por %p3221_p11, %p3220_p13 }
  0xe3   : > { %p3223_p5 = pnand %p3222_p3, %p3216_p7 }
  0xe5   : > { %3226 = shalt.err (!%p3223_p5)
}
  0xe6   : > { %2629 = dma.hbm_to_vmem [thread:$0]  (!%p3876_p2), %s3584_s27, 64, %s375_s5, %s3496_s23  }
  0xe7   : > { %p3879_p6 = scmp.ne.s32.totalorder %s3862_s16, 0 }
  0xe8   : > { %s385_s14 = sand.u32 (!%p3879_p6), 1, %s3368_s15   ;;  %s387_s13 = sand.u32 (!%p3879_p6), 1, %s3273_s10  }
  0xe9   : > { %383 = sbr.rel (%p3879_p6) target bundleno = 1139 (0x473), region = 56  ;;  %s2317_s1 = sshll.u32 (!%p3879_p6), %s387_s13, 10 }
  0xea   : > { %s386_s24 = scalar_lea.sflag (!%p3879_p6), [#allocation3], %s385_s14  ;;  %s3610_s2 = scalar_lea.vmem (!%p3879_p6), [#allocation2], %s2317_s1 }
  0xeb   : > { %p3880_p10 = scmp.ne.s32.totalorder (!%p3879_p6), %s3871_s25, 0 }
  0xf0   : > { %3244 = dma.done.wait (%p3880_p10), %s386_s24, 16384  }
  0xf1   : > { %3246 = vsyncadd (%p3880_p10), %s386_s24, 4294950912  ;;  %p3881_p12 = scmp.eq.s32.totalorder %s3368_s15, 0 }
  0xf3   : > { %3248 = dma.done.wait (%p3881_p12), [#allocation5], 64   ;;  %p3882_p2 = pmov %p3881_p12 }
  0xf4   : > { %s3620_s16 = sshll.u32 %s387_s13, 2 }
  0xf5   : > { %3250 = vsyncadd (%p3882_p2), [#allocation5], 4294967232  ;;  %s402_s22 = scalar_lea.vmem [#allocation6], %s3620_s16 }
  0xf6   : > { %3252 = dma.done.wait (%p3880_p10), %s386_s24, 64  }
  0xf7   : > { %3254 = vsyncadd (%p3880_p10), %s386_s24, 4294967232  ;;  %p3883_p0 = pmov %p3882_p2 }
  0xf9   : > { %3256 = dma.done.wait (%p3883_p0), [#allocation5], 8192   ;;  %p3884_p4 = pmov %p3883_p0 }
  0xfa   : > { %p3885_p8 = pmov %p3883_p0 }
  0xfb   : > { %3258 = vsyncadd (%p3884_p4), [#allocation5], 4294959104 }
  0xfc   : > { %3260 = dma.done.wait (%p3885_p8), [#allocation9], 64   ;;  %p3886_p9 = pmov %p3883_p0 }
  0xfd   : > { %p3887_p1 = pmov %p3883_p0 }
  0xfe   : > { %3262 = vsyncadd (%p3886_p9), [#allocation9], 4294967232 }
  0xff   : > { %3264 = dma.done.wait (%p3887_p1), [#allocation12], 2064   ;;  %p3888_p7 = pmov %p3883_p0 }
 0x100   : > { %v2687_v0 = vld [vmem:[%s3610_s2 + $0x4] ss:$16 sps:$4 sm:$0xff]   ;;  %v2691_v2 = vld [vmem:[%s3610_s2] ss:$16 sps:$4 sm:$0xff]   ;;  %v467_v48 = vld [vmem:[%s3836_s0 + $0x8] sm:$0xff]  ;;  %p461_p13 = scmp.lt.s32.totalorder %s3368_s15, 3 }
 0x101   : > { %3266 = vsyncadd (%p3888_p7), [#allocation12], 4294965232  ;;  %v2689_v1 = vld [vmem:[%s3610_s2 + $0x204] ss:$16 sps:$4 sm:$0xff]   ;;  %1250 = vmatprep.subr.bf16.mxu1 %v2687_v0  ;;  %v2692_v3 = vld [vmem:[%s3610_s2 + $0x200] ss:$16 sps:$4 sm:$0xff]   ;;  %v3693_v51 = vcombine.high %v467_v48, %v467_v48 }
 0x102   : > { %1291 = vmatprep.subr.bf16.mxu0 %v2689_v1  ;;  %v2693_v4 = vld [vmem:[%s3610_s2 + $0x24] ss:$16 sps:$4 sm:$0xff]   ;;  %1251 = vmatpush1.bf16.msra.mxu1 %v2691_v2  ;;  %v2697_v6 = vld [vmem:[%s3610_s2 + $0x20] ss:$16 sps:$4 sm:$0xff]   ;;  %s462_s17 = scalar_select %p461_p13, %s3368_s15, 3 }
 0x103   : > { %1292 = vmatpush1.bf16.msra.mxu0 %v2692_v3  ;;  %v2695_v5 = vld [vmem:[%s3610_s2 + $0x224] ss:$16 sps:$4 sm:$0xff]   ;;  %1252 = vmatprep.subr.bf16.mxu1 %v2693_v4  ;;  %v2698_v7 = vld [vmem:[%s3610_s2 + $0x220] ss:$16 sps:$4 sm:$0xff]   ;;  %v2789_v4 = vld [vmem:[%s3610_s2 + $0xc] ss:$16 sps:$4 sm:$0xff]  }
 0x104   : > { %1293 = vmatprep.subr.bf16.mxu0 %v2695_v5  ;;  %v2699_v8 = vld [vmem:[%s3610_s2 + $0x44] ss:$16 sps:$4 sm:$0xff]   ;;  %v2703_v10 = vld [vmem:[%s3610_s2 + $0x40] ss:$16 sps:$4 sm:$0xff]   ;;  %1323 = vmatprep.mubr.bf16.mxu0 %v3693_v51  ;;  %s2325_s5 = sshll.u32 %s462_s17, 3  ;;  %s3889_s12 = sld [smem:[#allocation26_spill]] }
 0x105   : > { %v2701_v9 = vld [vmem:[%s3610_s2 + $0x244] ss:$16 sps:$4 sm:$0xff]   ;;  %v2704_v11 = vld [vmem:[%s3610_s2 + $0x240] ss:$16 sps:$4 sm:$0xff]   ;;  %p2539_p11 = scmp.ne.s32.totalorder %s3368_s15, 3 }
 0x106   : > { %1253 = vmatpush1.bf16.msra.mxu1 %v2697_v6  ;;  %v2705_v12 = vld [vmem:[%s3610_s2 + $0x64] ss:$16 sps:$4 sm:$0xff]   ;;  %v2709_v14 = vld [vmem:[%s3610_s2 + $0x60] ss:$16 sps:$4 sm:$0xff]   ;;  %v3715_v6 = vcombine.low %v467_v48, %v467_v48 }
 0x107   : > { %1294 = vmatpush1.bf16.msra.mxu0 %v2698_v7  ;;  %1254 = vmatprep.subr.bf16.mxu1 %v2699_v8  ;;  %v2707_v13 = vld [vmem:[%s3610_s2 + $0x264] ss:$16 sps:$4 sm:$0xff]   ;;  %v2710_v15 = vld [vmem:[%s3610_s2 + $0x260] ss:$16 sps:$4 sm:$0xff]   ;;  %v2787_v7 = vld [vmem:[%s3610_s2 + $0x8] ss:$16 sps:$4 sm:$0xff]  }
 0x108   : > { %1295 = vmatprep.subr.bf16.mxu0 %v2701_v9  ;;  %v2711_v16 = vld [vmem:[%s3610_s2 + $0x84] ss:$16 sps:$4 sm:$0xff]   ;;  %v2715_v18 = vld [vmem:[%s3610_s2 + $0x80] ss:$16 sps:$4 sm:$0xff]   ;;  %v2792_v8 = vld [vmem:[%s3610_s2 + $0x2c] ss:$16 sps:$4 sm:$0xff]  }
 0x109   : > { %v2713_v17 = vld [vmem:[%s3610_s2 + $0x284] ss:$16 sps:$4 sm:$0xff]   ;;  %v2716_v19 = vld [vmem:[%s3610_s2 + $0x280] ss:$16 sps:$4 sm:$0xff]   ;;  %v2790_v9 = vld [vmem:[%s3610_s2 + $0x28] ss:$16 sps:$4 sm:$0xff]  }
 0x10a   : > { %1255 = vmatpush1.bf16.msra.mxu1 %v2703_v10  ;;  %v2717_v20 = vld [vmem:[%s3610_s2 + $0xa4] ss:$16 sps:$4 sm:$0xff]   ;;  %v2721_v22 = vld [vmem:[%s3610_s2 + $0xa0] ss:$16 sps:$4 sm:$0xff]   ;;  %v2795_v10 = vld [vmem:[%s3610_s2 + $0x4c] ss:$16 sps:$4 sm:$0xff]   ;;  %s464_s7 = scalar_lea.vmem %s3889_s12, %s2325_s5 }
 0x10b   : > { %1296 = vmatpush1.bf16.msra.mxu0 %v2704_v11  ;;  %1256 = vmatprep.subr.bf16.mxu1 %v2705_v12  ;;  %v2719_v21 = vld [vmem:[%s3610_s2 + $0x2a4] ss:$16 sps:$4 sm:$0xff]   ;;  %v2722_v23 = vld [vmem:[%s3610_s2 + $0x2a0] ss:$16 sps:$4 sm:$0xff]   ;;  %v2793_v11 = vld [vmem:[%s3610_s2 + $0x48] ss:$16 sps:$4 sm:$0xff]  }
 0x10c   : > { %1297 = vmatprep.subr.bf16.mxu0 %v2707_v13  ;;  %v2723_v24 = vld [vmem:[%s3610_s2 + $0xc4] ss:$16 sps:$4 sm:$0xff]   ;;  %v2727_v26 = vld [vmem:[%s3610_s2 + $0xc0] ss:$16 sps:$4 sm:$0xff]   ;;  %v2798_v12 = vld [vmem:[%s3610_s2 + $0x6c] ss:$16 sps:$4 sm:$0xff]  }
 0x10d   : > { %v2725_v25 = vld [vmem:[%s3610_s2 + $0x2c4] ss:$16 sps:$4 sm:$0xff]   ;;  %v2728_v27 = vld [vmem:[%s3610_s2 + $0x2c0] ss:$16 sps:$4 sm:$0xff]   ;;  %v2796_v13 = vld [vmem:[%s3610_s2 + $0x68] ss:$16 sps:$4 sm:$0xff]  }
 0x10e   : > { %1257 = vmatpush1.bf16.msra.mxu1 %v2709_v14  ;;  %v2729_v28 = vld [vmem:[%s3610_s2 + $0xe4] ss:$16 sps:$4 sm:$0xff]   ;;  %v2733_v30 = vld [vmem:[%s3610_s2 + $0xe0] ss:$16 sps:$4 sm:$0xff]   ;;  %v2801_v14 = vld [vmem:[%s3610_s2 + $0x8c] ss:$16 sps:$4 sm:$0xff]  }
 0x10f   : > { %1298 = vmatpush1.bf16.msra.mxu0 %v2710_v15  ;;  %1258 = vmatprep.subr.bf16.mxu1 %v2711_v16  ;;  %v2731_v29 = vld [vmem:[%s3610_s2 + $0x2e4] ss:$16 sps:$4 sm:$0xff]   ;;  %v2734_v31 = vld [vmem:[%s3610_s2 + $0x2e0] ss:$16 sps:$4 sm:$0xff]   ;;  %v2799_v15 = vld [vmem:[%s3610_s2 + $0x88] ss:$16 sps:$4 sm:$0xff]  }
 0x110   : > { %1299 = vmatprep.subr.bf16.mxu0 %v2713_v17  ;;  %v2735_v32 = vld [vmem:[%s3610_s2 + $0x104] ss:$16 sps:$4 sm:$0xff]   ;;  %v2739_v34 = vld [vmem:[%s3610_s2 + $0x100] ss:$16 sps:$4 sm:$0xff]   ;;  %v2804_v16 = vld [vmem:[%s3610_s2 + $0xac] ss:$16 sps:$4 sm:$0xff]  }
 0x111   : > { %v2737_v33 = vld [vmem:[%s3610_s2 + $0x304] ss:$16 sps:$4 sm:$0xff]   ;;  %v2740_v35 = vld [vmem:[%s3610_s2 + $0x300] ss:$16 sps:$4 sm:$0xff]   ;;  %v2802_v17 = vld [vmem:[%s3610_s2 + $0xa8] ss:$16 sps:$4 sm:$0xff]  }
 0x112   : > { %1259 = vmatpush1.bf16.msra.mxu1 %v2715_v18  ;;  %v2741_v36 = vld [vmem:[%s3610_s2 + $0x124] ss:$16 sps:$4 sm:$0xff]   ;;  %v2745_v38 = vld [vmem:[%s3610_s2 + $0x120] ss:$16 sps:$4 sm:$0xff]   ;;  %v2807_v18 = vld [vmem:[%s3610_s2 + $0xcc] ss:$16 sps:$4 sm:$0xff]  }
 0x113   : > { %1300 = vmatpush1.bf16.msra.mxu0 %v2716_v19  ;;  %1260 = vmatprep.subr.bf16.mxu1 %v2717_v20  ;;  %v2743_v37 = vld [vmem:[%s3610_s2 + $0x324] ss:$16 sps:$4 sm:$0xff]   ;;  %v2746_v39 = vld [vmem:[%s3610_s2 + $0x320] ss:$16 sps:$4 sm:$0xff]  }
 0x114   : > { %1301 = vmatprep.subr.bf16.mxu0 %v2719_v21  ;;  %v2747_v40 = vld [vmem:[%s3610_s2 + $0x144] ss:$16 sps:$4 sm:$0xff]   ;;  %v2751_v42 = vld [vmem:[%s3610_s2 + $0x140] ss:$16 sps:$4 sm:$0xff]   ;;  %v2805_v21 = vld [vmem:[%s3610_s2 + $0xc8] ss:$16 sps:$4 sm:$0xff]  }
 0x115   : > { %v2749_v41 = vld [vmem:[%s3610_s2 + $0x344] ss:$16 sps:$4 sm:$0xff]   ;;  %v2752_v43 = vld [vmem:[%s3610_s2 + $0x340] ss:$16 sps:$4 sm:$0xff]  }
 0x116   : > { %1261 = vmatpush1.bf16.msra.mxu1 %v2721_v22  ;;  %v2753_v44 = vld [vmem:[%s3610_s2 + $0x164] ss:$16 sps:$4 sm:$0xff]   ;;  %v2757_v49 = vld [vmem:[%s3610_s2 + $0x160] ss:$16 sps:$4 sm:$0xff]  }
 0x117   : > { %1302 = vmatpush1.bf16.msra.mxu0 %v2722_v23  ;;  %1262 = vmatprep.subr.bf16.mxu1 %v2723_v24  ;;  %v2755_v45 = vld [vmem:[%s3610_s2 + $0x364] ss:$16 sps:$4 sm:$0xff]   ;;  %v2758_v50 = vld [vmem:[%s3610_s2 + $0x360] ss:$16 sps:$4 sm:$0xff]   ;;  %v2810_v23 = vld [vmem:[%s3610_s2 + $0xec] ss:$16 sps:$4 sm:$0xff]  }
 0x118   : > { %1303 = vmatprep.subr.bf16.mxu0 %v2725_v25  ;;  %v466_v46 = vld [vmem:[%s3836_s0] sm:$0xff]  ;;  %v2883_v19 = vld [vmem:[#allocation7] ss:$8 sps:$4 sm:$0xff]   ;;  %v2885_v20 = vld [vmem:[#allocation7 + $0x4] ss:$8 sps:$4 sm:$0xff]  }
 0x119   : > { %v2327_v47 = vcombine.high %v466_v46, %v466_v46  ;;  %v2759_v52 = vld [vmem:[%s3610_s2 + $0x184] ss:$16 sps:$4 sm:$0xff]   ;;  %v2763_v54 = vld [vmem:[%s3610_s2 + $0x180] ss:$16 sps:$4 sm:$0xff]   ;;  %v3713_v5 = vcombine.low %v466_v46, %v466_v46  ;;  %v2823_v46 = vld [vmem:[%s3610_s2 + $0x188] ss:$16 sps:$4 sm:$0xff]  }
 0x11a   : > { %1263 = vmatpush1.bf16.msra.mxu1 %v2727_v26  ;;  %v2761_v53 = vld [vmem:[%s3610_s2 + $0x384] ss:$16 sps:$4 sm:$0xff]   ;;  %v2764_v55 = vld [vmem:[%s3610_s2 + $0x380] ss:$16 sps:$4 sm:$0xff]   ;;  %v2808_v26 = vld [vmem:[%s3610_s2 + $0xe8] ss:$16 sps:$4 sm:$0xff]  }
 0x11b   : > { %1304 = vmatpush1.bf16.msra.mxu0 %v2728_v27  ;;  %1264 = vmatprep.subr.bf16.mxu1 %v2729_v28  ;;  %v2765_v56 = vld [vmem:[%s3610_s2 + $0x1a4] ss:$16 sps:$4 sm:$0xff]   ;;  %v2769_v58 = vld [vmem:[%s3610_s2 + $0x1a0] ss:$16 sps:$4 sm:$0xff]   ;;  %v2813_v27 = vld [vmem:[%s3610_s2 + $0x10c] ss:$16 sps:$4 sm:$0xff]  }
 0x11c   : > { %1305 = vmatprep.subr.bf16.mxu0 %v2731_v29  ;;  %1282 = vmatprep.mubr.bf16.mxu1 %v2327_v47  ;;  %v2767_v57 = vld [vmem:[%s3610_s2 + $0x3a4] ss:$16 sps:$4 sm:$0xff]   ;;  %v2770_v59 = vld [vmem:[%s3610_s2 + $0x3a0] ss:$16 sps:$4 sm:$0xff]  }
 0x11d   : > { %v2771_v60 = vld [vmem:[%s3610_s2 + $0x1c4] ss:$16 sps:$4 sm:$0xff]   ;;  %v2775_v62 = vld [vmem:[%s3610_s2 + $0x1c0] ss:$16 sps:$4 sm:$0xff]  }
 0x11e   : > { %1265 = vmatpush1.bf16.msra.mxu1 %v2733_v30  ;;  %v2773_v61 = vld [vmem:[%s3610_s2 + $0x3c4] ss:$16 sps:$4 sm:$0xff]   ;;  %v2776_v63 = vld [vmem:[%s3610_s2 + $0x3c0] ss:$16 sps:$4 sm:$0xff]   ;;  %v2811_v30 = vld [vmem:[%s3610_s2 + $0x108] ss:$16 sps:$4 sm:$0xff]  }
 0x11f   : > { %1306 = vmatpush1.bf16.msra.mxu0 %v2734_v31  ;;  %1266 = vmatprep.subr.bf16.mxu1 %v2735_v32  ;;  %v2777_v0 = vld [vmem:[%s3610_s2 + $0x1e4] ss:$16 sps:$4 sm:$0xff]   ;;  %v2781_v2 = vld [vmem:[%s3610_s2 + $0x1e0] ss:$16 sps:$4 sm:$0xff]   ;;  %v2816_v31 = vld [vmem:[%s3610_s2 + $0x12c] ss:$16 sps:$4 sm:$0xff]  }
 0x120   : > { %1307 = vmatprep.subr.bf16.mxu0 %v2737_v33  ;;  %v2779_v1 = vld [vmem:[%s3610_s2 + $0x3e4] ss:$16 sps:$4 sm:$0xff]   ;;  %v2782_v3 = vld [vmem:[%s3610_s2 + $0x3e0] ss:$16 sps:$4 sm:$0xff]  }
 0x121   : > { %v2888_v22 = vld [vmem:[#allocation7 + $0x14] ss:$8 sps:$4 sm:$0xff]   ;;  %v2886_v24 = vld [vmem:[#allocation7 + $0x10] ss:$8 sps:$4 sm:$0xff]   ;;  %v2891_v25 = vld [vmem:[#allocation7 + $0x24] ss:$8 sps:$4 sm:$0xff]  }
 0x122   : > { %1267 = vmatpush1.bf16.msra.mxu1 %v2739_v34  ;;  %v2889_v28 = vld [vmem:[#allocation7 + $0x20] ss:$8 sps:$4 sm:$0xff]   ;;  %v2894_v29 = vld [vmem:[#allocation7 + $0x34] ss:$8 sps:$4 sm:$0xff]   ;;  %v2892_v32 = vld [vmem:[#allocation7 + $0x30] ss:$8 sps:$4 sm:$0xff]  }
 0x123   : > { %1308 = vmatpush1.bf16.msra.mxu0 %v2740_v35  ;;  %1268 = vmatprep.subr.bf16.mxu1 %v2741_v36  ;;  %v2897_v33 = vld [vmem:[#allocation7 + $0x44] ss:$8 sps:$4 sm:$0xff]   ;;  %v2819_v35 = vld [vmem:[%s3610_s2 + $0x14c] ss:$16 sps:$4 sm:$0xff]  }
 0x124   : > { %1309 = vmatprep.subr.bf16.mxu0 %v2743_v37  ;;  %v2814_v34 = vld [vmem:[%s3610_s2 + $0x128] ss:$16 sps:$4 sm:$0xff]   ;;  %v2895_v37 = vld [vmem:[#allocation7 + $0x40] ss:$8 sps:$4 sm:$0xff]   ;;  %v2904_v48 = vld [vmem:[#allocation7 + $0x70] ss:$8 sps:$4 sm:$0xff]  }
 0x125   : > { %v2817_v36 = vld [vmem:[%s3610_s2 + $0x148] ss:$16 sps:$4 sm:$0xff]  }
 0x126   : > { %1269 = vmatpush1.bf16.msra.mxu1 %v2745_v38  ;;  %v2822_v38 = vld [vmem:[%s3610_s2 + $0x16c] ss:$16 sps:$4 sm:$0xff]  }
 0x127   : > { %1310 = vmatpush1.bf16.msra.mxu0 %v2746_v39  ;;  %1270 = vmatprep.subr.bf16.mxu1 %v2747_v40  ;;  %v2900_v39 = vld [vmem:[#allocation7 + $0x54] ss:$8 sps:$4 sm:$0xff]   ;;  %v2898_v40 = vld [vmem:[#allocation7 + $0x50] ss:$8 sps:$4 sm:$0xff]  }
 0x128   : > { %1311 = vmatprep.subr.bf16.mxu0 %v2749_v41  ;;  %v2903_v41 = vld [vmem:[#allocation7 + $0x64] ss:$8 sps:$4 sm:$0xff]  }
 0x12a   : > { %1271 = vmatpush1.bf16.msra.mxu1 %v2751_v42  ;;  %v2820_v42 = vld [vmem:[%s3610_s2 + $0x168] ss:$16 sps:$4 sm:$0xff]  }
 0x12b   : > { %1312 = vmatpush1.bf16.msra.mxu0 %v2752_v43  ;;  %1272 = vmatprep.subr.bf16.mxu1 %v2753_v44  ;;  %v2825_v43 = vld [vmem:[%s3610_s2 + $0x18c] ss:$16 sps:$4 sm:$0xff]  }
 0x12c   : > { %1313 = vmatprep.subr.bf16.mxu0 %v2755_v45  ;;  %v2901_v44 = vld [vmem:[#allocation7 + $0x60] ss:$8 sps:$4 sm:$0xff]   ;;  %v2906_v45 = vld [vmem:[#allocation7 + $0x74] ss:$8 sps:$4 sm:$0xff]  }
 0x12e   : > { %1273 = vmatpush1.bf16.msra.mxu1 %v2757_v49  ;;  %v2909_v49 = vld [vmem:[#allocation7 + $0x84] ss:$8 sps:$4 sm:$0xff]  }
 0x12f   : > { %1314 = vmatpush1.bf16.msra.mxu0 %v2758_v50  ;;  %1274 = vmatprep.subr.bf16.mxu1 %v2759_v52  ;;  %v2826_v50 = vld [vmem:[%s3610_s2 + $0x1a8] ss:$16 sps:$4 sm:$0xff]   ;;  %v2831_v52 = vld [vmem:[%s3610_s2 + $0x1cc] ss:$16 sps:$4 sm:$0xff]  }
 0x130   : > { %1315 = vmatprep.subr.bf16.mxu0 %v2761_v53  ;;  %v2907_v53 = vld [vmem:[#allocation7 + $0x80] ss:$8 sps:$4 sm:$0xff]  }
 0x132   : > { %1275 = vmatpush1.bf16.msra.mxu1 %v2763_v54  ;;  %v2912_v54 = vld [vmem:[#allocation7 + $0x94] ss:$8 sps:$4 sm:$0xff]  }
 0x133   : > { %1316 = vmatpush1.bf16.msra.mxu0 %v2764_v55  ;;  %1276 = vmatprep.subr.bf16.mxu1 %v2765_v56  ;;  %v2829_v55 = vld [vmem:[%s3610_s2 + $0x1c8] ss:$16 sps:$4 sm:$0xff]   ;;  %v2834_v56 = vld [vmem:[%s3610_s2 + $0x1ec] ss:$16 sps:$4 sm:$0xff]  }
 0x134   : > { %1317 = vmatprep.subr.bf16.mxu0 %v2767_v57  ;;  %v2910_v57 = vld [vmem:[#allocation7 + $0x90] ss:$8 sps:$4 sm:$0xff]  }
 0x136   : > { %1277 = vmatpush1.bf16.msra.mxu1 %v2769_v58  ;;  %v2915_v58 = vld [vmem:[#allocation7 + $0xa4] ss:$8 sps:$4 sm:$0xff]  }
 0x137   : > { %1318 = vmatpush1.bf16.msra.mxu0 %v2770_v59  ;;  %1278 = vmatprep.subr.bf16.mxu1 %v2771_v60  ;;  %v2832_v59 = vld [vmem:[%s3610_s2 + $0x1e8] ss:$16 sps:$4 sm:$0xff]   ;;  %v2837_v60 = vld [vmem:[%s3610_s2 + $0x20c] ss:$16 sps:$4 sm:$0xff]  }
 0x138   : > { %1319 = vmatprep.subr.bf16.mxu0 %v2773_v61  ;;  %v2913_v61 = vld [vmem:[#allocation7 + $0xa0] ss:$8 sps:$4 sm:$0xff]  }
 0x13a   : > { %1279 = vmatpush1.bf16.msra.mxu1 %v2775_v62  ;;  %v2918_v62 = vld [vmem:[#allocation7 + $0xb4] ss:$8 sps:$4 sm:$0xff]  }
 0x13b   : > { %1320 = vmatpush1.bf16.msra.mxu0 %v2776_v63  ;;  %1280 = vmatprep.subr.bf16.mxu1 %v2777_v0  ;;  %v2835_v63 = vld [vmem:[%s3610_s2 + $0x208] ss:$16 sps:$4 sm:$0xff]   ;;  %v2840_v0 = vld [vmem:[%s3610_s2 + $0x22c] ss:$16 sps:$4 sm:$0xff]  }
 0x13c   : > { %1321 = vmatprep.subr.bf16.mxu0 %v2779_v1  ;;  %v2916_v1 = vld [vmem:[#allocation7 + $0xb0] ss:$8 sps:$4 sm:$0xff]  }
 0x13e   : > { %1281 = vmatpush1.bf16.msra.mxu1 %v2781_v2  ;;  %v2921_v2 = vld [vmem:[#allocation7 + $0xc4] ss:$8 sps:$4 sm:$0xff]  }
 0x13f   : > { %1322 = vmatpush1.bf16.msra.mxu0 %v2782_v3  ;;  %1332 = vmatprep.subr.bf16.mxu1 %v2789_v4  ;;  %v2838_v3 = vld [vmem:[%s3610_s2 + $0x228] ss:$16 sps:$4 sm:$0xff]   ;;  %v2843_v4 = vld [vmem:[%s3610_s2 + $0x24c] ss:$16 sps:$4 sm:$0xff]  }
 0x140   : > { %1858 = vmatprep.subr.bf16.mxu0 %v2885_v20  ;;  %v2856_v20 = vld [vmem:[%s3610_s2 + $0x2e8] ss:$16 sps:$4 sm:$0xff]  }
 0x141   : > { %1283 = vmatmul.mubr.bf16.vlgmr.msra.gmra.mrb[0].mxu1 %v3713_v5 }
 0x142   : > { %1324 = vmatmul.mubr.bf16.vlgmr.msra.gmra.mrb[0].mxu0 %v3715_v6  ;;  %1333 = vmatpush1.bf16.msra.mxu1 %v2787_v7  ;;  %v2919_v7 = vld [vmem:[#allocation7 + $0xc0] ss:$8 sps:$4 sm:$0xff]  }
 0x143   : > { %1364 = vmatprep.mubr.bf16.mxu1 %v2327_v47  ;;  %1334 = vmatprep.subr.bf16.mxu1 %v2792_v8  ;;  %v2828_v47 = vld [vmem:[%s3610_s2 + $0x1ac] ss:$16 sps:$4 sm:$0xff]   ;;  %v2841_v8 = vld [vmem:[%s3610_s2 + $0x248] ss:$16 sps:$4 sm:$0xff]  }
 0x144   : > { %1859 = vmatpush1.bf16.msra.mxu0 %v2883_v19  ;;  %v2925_v19 = vld [vmem:[#allocation7 + $0xe0] ss:$8 sps:$4 sm:$0xff]  }
 0x145   : > { %1860 = vmatprep.subr.bf16.mxu0 %v2888_v22  ;;  %v2930_v22 = vld [vmem:[#allocation7 + $0xf4] ss:$8 sps:$4 sm:$0xff]  }
 0x146   : > { %1335 = vmatpush1.bf16.msra.mxu1 %v2790_v9  ;;  %v2844_v9 = vld [vmem:[%s3610_s2 + $0x268] ss:$16 sps:$4 sm:$0xff]  }
 0x147   : > { %1336 = vmatprep.subr.bf16.mxu1 %v2795_v10  ;;  %v2849_v10 = vld [vmem:[%s3610_s2 + $0x28c] ss:$16 sps:$4 sm:$0xff]  }
 0x148   : > { %1861 = vmatpush1.bf16.msra.mxu0 %v2886_v24  ;;  %v2859_v24 = vld [vmem:[%s3610_s2 + $0x308] ss:$16 sps:$4 sm:$0xff]  }
 0x149   : > { %1862 = vmatprep.subr.bf16.mxu0 %v2891_v25  ;;  %v2864_v25 = vld [vmem:[%s3610_s2 + $0x32c] ss:$16 sps:$4 sm:$0xff]  }
 0x14a   : > { %1337 = vmatpush1.bf16.msra.mxu1 %v2793_v11  ;;  %v2852_v11 = vld [vmem:[%s3610_s2 + $0x2ac] ss:$16 sps:$4 sm:$0xff]  }
 0x14b   : > { %1338 = vmatprep.subr.bf16.mxu1 %v2798_v12  ;;  %v2850_v12 = vld [vmem:[%s3610_s2 + $0x2a8] ss:$16 sps:$4 sm:$0xff]  }
 0x14c   : > { %1863 = vmatpush1.bf16.msra.mxu0 %v2889_v28  ;;  %v2867_v28 = vld [vmem:[%s3610_s2 + $0x34c] ss:$16 sps:$4 sm:$0xff]  }
 0x14d   : > { %1864 = vmatprep.subr.bf16.mxu0 %v2894_v29  ;;  %v2865_v29 = vld [vmem:[%s3610_s2 + $0x348] ss:$16 sps:$4 sm:$0xff]  }
 0x14e   : > { %1339 = vmatpush1.bf16.msra.mxu1 %v2796_v13  ;;  %v2855_v13 = vld [vmem:[%s3610_s2 + $0x2cc] ss:$16 sps:$4 sm:$0xff]  }
 0x14f   : > { %1340 = vmatprep.subr.bf16.mxu1 %v2801_v14  ;;  %v2924_v14 = vld [vmem:[#allocation7 + $0xd4] ss:$8 sps:$4 sm:$0xff]  }
 0x150   : > { %1865 = vmatpush1.bf16.msra.mxu0 %v2892_v32  ;;  %v2873_v32 = vld [vmem:[%s3610_s2 + $0x38c] ss:$16 sps:$4 sm:$0xff]  }
 0x151   : > { %1866 = vmatprep.subr.bf16.mxu0 %v2897_v33  ;;  %v2871_v33 = vld [vmem:[%s3610_s2 + $0x388] ss:$16 sps:$4 sm:$0xff]  }
 0x152   : > { %1341 = vmatpush1.bf16.msra.mxu1 %v2799_v15  ;;  %v2922_v15 = vld [vmem:[#allocation7 + $0xd0] ss:$8 sps:$4 sm:$0xff]  }
 0x153   : > { %1342 = vmatprep.subr.bf16.mxu1 %v2804_v16  ;;  %v2853_v16 = vld [vmem:[%s3610_s2 + $0x2c8] ss:$16 sps:$4 sm:$0xff]  }
 0x154   : > { %1867 = vmatpush1.bf16.msra.mxu0 %v2895_v37  ;;  %v2877_v37 = vld [vmem:[%s3610_s2 + $0x3c8] ss:$16 sps:$4 sm:$0xff]  }
 0x155   : > { %1868 = vmatprep.subr.bf16.mxu0 %v2900_v39  ;;  %v2880_v39 = vld [vmem:[%s3610_s2 + $0x3e8] ss:$16 sps:$4 sm:$0xff]  }
 0x156   : > { %1343 = vmatpush1.bf16.msra.mxu1 %v2802_v17  ;;  %v2858_v17 = vld [vmem:[%s3610_s2 + $0x2ec] ss:$16 sps:$4 sm:$0xff]  }
 0x157   : > { %1344 = vmatprep.subr.bf16.mxu1 %v2807_v18  ;;  %v2927_v18 = vld [vmem:[#allocation7 + $0xe4] ss:$8 sps:$4 sm:$0xff]  }
 0x158   : > { %1869 = vmatpush1.bf16.msra.mxu0 %v2898_v40  ;;  %v1416_v40 = vlaneseq }
 0x159   : > { %1870 = vmatprep.subr.bf16.mxu0 %v2903_v41 }
 0x15a   : > { %1345 = vmatpush1.bf16.msra.mxu1 %v2805_v21  ;;  %v2861_v21 = vld [vmem:[%s3610_s2 + $0x30c] ss:$16 sps:$4 sm:$0xff]   ;;  %v3785_v41 = vshrl.u32 %v1416_v40, 7  ;;  %v2972_v40 = vld [vmem:[#allocation7 + $0x1d4] ss:$8 sps:$4 sm:$0xff]  }
 0x15b   : > { %1346 = vmatprep.subr.bf16.mxu1 %v2810_v23  ;;  %v2928_v23 = vld [vmem:[#allocation7 + $0xf0] ss:$8 sps:$4 sm:$0xff]  }
 0x15c   : > { %1871 = vmatpush1.bf16.msra.mxu0 %v2901_v44  ;;  %v3793_v44 = vsub.s32 1, %v3785_v41 }
 0x15d   : > { %1872 = vmatprep.subr.bf16.mxu0 %v2906_v45  ;;  %v3797_v45 = vld [vmem:[%s402_s22] sm:$0xf] }
 0x15e   : > { %1347 = vmatpush1.bf16.msra.mxu1 %v2808_v26  ;;  %v2933_v26 = vld [vmem:[#allocation7 + $0x104] ss:$8 sps:$4 sm:$0xff]  }
 0x15f   : > { %1348 = vmatprep.subr.bf16.mxu1 %v2813_v27  ;;  %v2862_v27 = vld [vmem:[%s3610_s2 + $0x328] ss:$16 sps:$4 sm:$0xff]  }
 0x160   : > { %1873 = vmatpush1.bf16.msra.mxu0 %v2904_v48 }
 0x161   : > { %1874 = vmatprep.subr.bf16.mxu0 %v2909_v49 }
 0x162   : > { %1349 = vmatpush1.bf16.msra.mxu1 %v2811_v30  ;;  %v2870_v30 = vld [vmem:[%s3610_s2 + $0x36c] ss:$16 sps:$4 sm:$0xff]  }
 0x163   : > { %1350 = vmatprep.subr.bf16.mxu1 %v2816_v31  ;;  %v2868_v31 = vld [vmem:[%s3610_s2 + $0x368] ss:$16 sps:$4 sm:$0xff]  }
 0x164   : > { %1875 = vmatpush1.bf16.msra.mxu0 %v2907_v53 }
 0x165   : > { %1876 = vmatprep.subr.bf16.mxu0 %v2912_v54 }
 0x166   : > { %1351 = vmatpush1.bf16.msra.mxu1 %v2814_v34  ;;  %v2876_v34 = vld [vmem:[%s3610_s2 + $0x3ac] ss:$16 sps:$4 sm:$0xff]  }
 0x167   : > { %1352 = vmatprep.subr.bf16.mxu1 %v2819_v35  ;;  %v2874_v35 = vld [vmem:[%s3610_s2 + $0x3a8] ss:$16 sps:$4 sm:$0xff]  }
 0x168   : > { %1877 = vmatpush1.bf16.msra.mxu0 %v2910_v57 }
 0x169   : > { %1878 = vmatprep.subr.bf16.mxu0 %v2915_v58 }
 0x16a   : > { %1353 = vmatpush1.bf16.msra.mxu1 %v2817_v36  ;;  %v2879_v36 = vld [vmem:[%s3610_s2 + $0x3cc] ss:$16 sps:$4 sm:$0xff]  }
 0x16b   : > { %1354 = vmatprep.subr.bf16.mxu1 %v2822_v38  ;;  %v2882_v38 = vld [vmem:[%s3610_s2 + $0x3ec] ss:$16 sps:$4 sm:$0xff]  }
 0x16c   : > { %1879 = vmatpush1.bf16.msra.mxu0 %v2913_v61 }
 0x16d   : > { %1880 = vmatprep.subr.bf16.mxu0 %v2918_v62 }
 0x16e   : > { %1355 = vmatpush1.bf16.msra.mxu1 %v2820_v42  ;;  %v3788_v42 = vsub.s32 0, %v3785_v41 }
 0x16f   : > { %1356 = vmatprep.subr.bf16.mxu1 %v2825_v43  ;;  %v3790_v43 = vld [vmem:[#allocation4] sm:$0xf] }
 0x170   : > { %1881 = vmatpush1.bf16.msra.mxu0 %v2916_v1 }
 0x171   : > { %1882 = vmatprep.subr.bf16.mxu0 %v2921_v2 }
 0x172   : > { %1357 = vmatpush1.bf16.msra.mxu1 %v2823_v46  ;;  %v1419_v46 = vrot.slane %v3790_v43, %v3788_v42 }
 0x173   : > { %1358 = vmatprep.subr.bf16.mxu1 %v2828_v47 }
 0x174   : > { %1883 = vmatpush1.bf16.msra.mxu0 %v2919_v7  ;;  %v2936_v7 = vld [vmem:[#allocation7 + $0x114] ss:$8 sps:$4 sm:$0xff]  }
 0x175   : > { %1884 = vmatprep.subr.bf16.mxu0 %v2924_v14  ;;  %v2984_v14 = vld [vmem:[#allocation11 + $0x10] sm:$0xff]  }
 0x176   : > { %1359 = vmatpush1.bf16.msra.mxu1 %v2826_v50  ;;  %v1445_v50 = vrot.slane %v3797_v45, %v3788_v42 }
 0x177   : > { %1360 = vmatprep.subr.bf16.mxu1 %v2831_v52 }
 0x178   : > { %1885 = vmatpush1.bf16.msra.mxu0 %v2922_v15  ;;  %v2942_v15 = vld [vmem:[#allocation7 + $0x134] ss:$8 sps:$4 sm:$0xff]  }
 0x179   : > { %1886 = vmatprep.subr.bf16.mxu0 %v2927_v18  ;;  %v2986_v18 = vld [vmem:[#allocation11 + $0x18] sm:$0xff]  }
 0x17a   : > { %1361 = vmatpush1.bf16.msra.mxu1 %v2829_v55  ;;  %v1449_v55 = vrot.slane %v3797_v45, %v3793_v44 }
 0x17b   : > { %1362 = vmatprep.subr.bf16.mxu1 %v2834_v56 }
 0x17c   : > { %1887 = vmatpush1.bf16.msra.mxu0 %v2925_v19  ;;  %v2945_v19 = vld [vmem:[#allocation7 + $0x144] ss:$8 sps:$4 sm:$0xff]  }
 0x17d   : > { %1888 = vmatprep.subr.bf16.mxu0 %v2930_v22  ;;  %v2988_v22 = vld [vmem:[#allocation11 + $0x20] sm:$0xff]  }
 0x17e   : > { %1363 = vmatpush1.bf16.msra.mxu1 %v2832_v59 }
 0x17f   : > { %1373 = vmatprep.subr.bf16.mxu1 %v2837_v60 }
 0x180   : > { %1889 = vmatpush1.bf16.msra.mxu0 %v2928_v23  ;;  %v2948_v23 = vld [vmem:[#allocation7 + $0x154] ss:$8 sps:$4 sm:$0xff]  }
 0x181   : > { %1365 = vmatmul.mubr.bf16.vlgmr.msra.gmra.mrb[4].mxu1 %v3713_v5  ;;  %v2846_v5 = vld [vmem:[%s3610_s2 + $0x26c] ss:$16 sps:$4 sm:$0xff]   ;;  %1899 = vmatprep.subr.bf16.mxu0 %v2933_v26  ;;  %v2951_v26 = vld [vmem:[#allocation7 + $0x164] ss:$8 sps:$4 sm:$0xff]  }
 0x182   : > { %1374 = vmatpush1.bf16.msra.mxu1 %v2835_v63  ;;  %1405 = vmatprep.mubr.bf16.mxu1 %v3693_v51  ;;  %v2847_v51 = vld [vmem:[%s3610_s2 + $0x288] ss:$16 sps:$4 sm:$0xff]  }
 0x183   : > { %1375 = vmatprep.subr.bf16.mxu1 %v2840_v0 }
 0x186   : > { %1376 = vmatpush1.bf16.msra.mxu1 %v2838_v3 }
 0x187   : > { %1377 = vmatprep.subr.bf16.mxu1 %v2843_v4  ;;  %v2931_v4 = vld [vmem:[#allocation7 + $0x100] ss:$8 sps:$4 sm:$0xff]  }
 0x18a   : > { %1378 = vmatpush1.bf16.msra.mxu1 %v2841_v8  ;;  %v2979_v8 = vld [vmem:[#allocation11 + $0x40] sm:$0xff]  }
 0x18b   : > { %1379 = vmatprep.subr.bf16.mxu1 %v2846_v5  ;;  %v2980_v5 = vld [vmem:[#allocation11] sm:$0xff]  }
 0x18e   : > { %1380 = vmatpush1.bf16.msra.mxu1 %v2844_v9  ;;  %v2981_v9 = vld [vmem:[#allocation11 + $0x48] sm:$0xff]  }
 0x18f   : > { %1381 = vmatprep.subr.bf16.mxu1 %v2849_v10  ;;  %v2934_v10 = vld [vmem:[#allocation7 + $0x110] ss:$8 sps:$4 sm:$0xff]  }
 0x192   : > { %1382 = vmatpush1.bf16.msra.mxu1 %v2847_v51  ;;  %v2982_v51 = vld [vmem:[#allocation11 + $0x8] sm:$0xff]  }
 0x193   : > { %1383 = vmatprep.subr.bf16.mxu1 %v2852_v11  ;;  %v2939_v11 = vld [vmem:[#allocation7 + $0x124] ss:$8 sps:$4 sm:$0xff]  }
 0x196   : > { %1384 = vmatpush1.bf16.msra.mxu1 %v2850_v12  ;;  %v2983_v12 = vld [vmem:[#allocation11 + $0x50] sm:$0xff]  }
 0x197   : > { %1385 = vmatprep.subr.bf16.mxu1 %v2855_v13  ;;  %v2937_v13 = vld [vmem:[#allocation7 + $0x120] ss:$8 sps:$4 sm:$0xff]  }
 0x19a   : > { %1386 = vmatpush1.bf16.msra.mxu1 %v2853_v16  ;;  %v2985_v16 = vld [vmem:[#allocation11 + $0x58] sm:$0xff]  }
 0x19b   : > { %1387 = vmatprep.subr.bf16.mxu1 %v2858_v17  ;;  %v2940_v17 = vld [vmem:[#allocation7 + $0x130] ss:$8 sps:$4 sm:$0xff]  }
 0x19e   : > { %1388 = vmatpush1.bf16.msra.mxu1 %v2856_v20  ;;  %v2987_v20 = vld [vmem:[#allocation11 + $0x60] sm:$0xff]  }
 0x19f   : > { %1389 = vmatprep.subr.bf16.mxu1 %v2861_v21  ;;  %v2943_v21 = vld [vmem:[#allocation7 + $0x140] ss:$8 sps:$4 sm:$0xff]  }
 0x1a2   : > { %1390 = vmatpush1.bf16.msra.mxu1 %v2859_v24  ;;  %v2989_v24 = vld [vmem:[#allocation11 + $0x68] sm:$0xff]  }
 0x1a3   : > { %1391 = vmatprep.subr.bf16.mxu1 %v2864_v25  ;;  %v2946_v25 = vld [vmem:[#allocation7 + $0x150] ss:$8 sps:$4 sm:$0xff]  }
 0x1a6   : > { %1392 = vmatpush1.bf16.msra.mxu1 %v2862_v27  ;;  %v2949_v27 = vld [vmem:[#allocation7 + $0x160] ss:$8 sps:$4 sm:$0xff]  }
 0x1a7   : > { %1393 = vmatprep.subr.bf16.mxu1 %v2867_v28  ;;  %v2954_v28 = vld [vmem:[#allocation7 + $0x174] ss:$8 sps:$4 sm:$0xff]  }
 0x1aa   : > { %1394 = vmatpush1.bf16.msra.mxu1 %v2865_v29  ;;  %v2952_v29 = vld [vmem:[#allocation7 + $0x170] ss:$8 sps:$4 sm:$0xff]  }
 0x1ab   : > { %1395 = vmatprep.subr.bf16.mxu1 %v2870_v30  ;;  %v2957_v30 = vld [vmem:[#allocation7 + $0x184] ss:$8 sps:$4 sm:$0xff]  }
 0x1ae   : > { %1396 = vmatpush1.bf16.msra.mxu1 %v2868_v31  ;;  %v2955_v31 = vld [vmem:[#allocation7 + $0x180] ss:$8 sps:$4 sm:$0xff]  }
 0x1af   : > { %1397 = vmatprep.subr.bf16.mxu1 %v2873_v32  ;;  %v2960_v32 = vld [vmem:[#allocation7 + $0x194] ss:$8 sps:$4 sm:$0xff]  }
 0x1b2   : > { %1398 = vmatpush1.bf16.msra.mxu1 %v2871_v33  ;;  %v2958_v33 = vld [vmem:[#allocation7 + $0x190] ss:$8 sps:$4 sm:$0xff]  }
 0x1b3   : > { %1399 = vmatprep.subr.bf16.mxu1 %v2876_v34  ;;  %v2963_v34 = vld [vmem:[#allocation7 + $0x1a4] ss:$8 sps:$4 sm:$0xff]  }
 0x1b6   : > { %1400 = vmatpush1.bf16.msra.mxu1 %v2874_v35  ;;  %v2961_v35 = vld [vmem:[#allocation7 + $0x1a0] ss:$8 sps:$4 sm:$0xff]  }
 0x1b7   : > { %1401 = vmatprep.subr.bf16.mxu1 %v2879_v36  ;;  %v2966_v36 = vld [vmem:[#allocation7 + $0x1b4] ss:$8 sps:$4 sm:$0xff]  }
 0x1ba   : > { %1402 = vmatpush1.bf16.msra.mxu1 %v2877_v37  ;;  %v2964_v37 = vld [vmem:[#allocation7 + $0x1b0] ss:$8 sps:$4 sm:$0xff]  }
 0x1bb   : > { %1403 = vmatprep.subr.bf16.mxu1 %v2882_v38  ;;  %v2969_v38 = vld [vmem:[#allocation7 + $0x1c4] ss:$8 sps:$4 sm:$0xff]  }
 0x1be   : > { %1404 = vmatpush1.bf16.msra.mxu1 %v2880_v39  ;;  %v2967_v39 = vld [vmem:[#allocation7 + $0x1c0] ss:$8 sps:$4 sm:$0xff]  }
 0x1bf   : > { %2544 = vmatprep.subr.bf16.mxu1 %v2979_v8  ;;  %v2994_v8 = vld [vmem:[#allocation11 + $0x38] sm:$0xff]  }
 0x1c1   : > { %1406 = vmatmul.mubr.bf16.vlgmr.msra.gmra.mrb[4].mxu1 %v3715_v6  ;;  %v1423_v6 = vrot.slane %v3790_v43, %v3793_v44 }
 0x1c2   : > { %2545 = vmatpush3.bf16.msra.mxu1 %v2980_v5  ;;  %v1940_v5 = vld [vmem:[#allocation8] sm:$0x3] }
 0x1c3   : > { %2546 = vmatprep.subr.bf16.mxu1 %v2981_v9  ;;  %v1954_v9 = vld [vmem:[#allocation10] sm:$0x3] }
 0x1c6   : > { %2547 = vmatpush3.bf16.msra.mxu1 %v2982_v51  ;;  %v1949_v51 = vrot.slane %v1940_v5, %v3793_v44 }
 0x1c7   : > { %2548 = vmatprep.subr.bf16.mxu1 %v2983_v12 }
 0x1ca   : > { %2549 = vmatpush3.bf16.msra.mxu1 %v2984_v14 }
 0x1cb   : > { %2550 = vmatprep.subr.bf16.mxu1 %v2985_v16 }
 0x1ce   : > { %2551 = vmatpush3.bf16.msra.mxu1 %v2986_v18 }
 0x1cf   : > { %2552 = vmatprep.subr.bf16.mxu1 %v2987_v20 }
 0x1d2   : > { %2553 = vmatpush3.bf16.msra.mxu1 %v2988_v22 }
 0x1d3   : > { %2554 = vmatprep.subr.bf16.mxu1 %v2989_v24 }
 0x214   : > { %v1284_v47 = vpop.f32.mrb[0].mxu1 }
 0x215   : > { %v1325_v48 = vpop.f32.mrb[0].mxu0  ;;  %v1286_v52 = vpop.f32.mrb[1].mxu1 }
 0x216   : > { %v1326_v49 = vadd.f32 %v1325_v48, %v1284_v47  ;;  %v1327_v53 = vpop.f32.mrb[1].mxu0  ;;  %v1288_v56 = vpop.f32.mrb[2].mxu1  ;;  %v2975_v47 = vld [vmem:[#allocation7 + $0x1e4] ss:$8 sps:$4 sm:$0xff]   ;;  %v2973_v48 = vld [vmem:[#allocation7 + $0x1e0] ss:$8 sps:$4 sm:$0xff]  }
 0x217   : > { %v1328_v54 = vadd.f32 %v1327_v53, %v1286_v52  ;;  %v1329_v57 = vpop.f32.mrb[2].mxu0  ;;  %v1289_v59 = vpop.f32.mrb[3].mxu1  ;;  %v1430_v52 = vsub.s32 3, %v3785_v41 }
 0x218   : > { %v1436_v58 = vmul.f32 %v1419_v46, %v1326_v49  ;;  %v1330_v60 = vpop.f32.mrb[3].mxu0  ;;  %v2970_v46 = vld [vmem:[#allocation7 + $0x1d0] ss:$8 sps:$4 sm:$0xff]  }
 0x219   : > { %v1437_v61 = vmul.f32 %v1423_v6, %v1328_v54  ;;  %v2978_v6 = vld [vmem:[#allocation7 + $0x1f4] ss:$8 sps:$4 sm:$0xff]   ;;  %v2976_v49 = vld [vmem:[#allocation7 + $0x1f0] ss:$8 sps:$4 sm:$0xff]   ;;  %v1431_v54 = vrot.slane %v3790_v43, %v1430_v52  ;;  %v1457_v57 = vrot.slane %v3797_v45, %v1430_v52 }
 0x21a   : > { %v1462_v62 = vadd.f32 %v1445_v50, %v1436_v58  ;;  %v1426_v50 = vsub.s32 2, %v3785_v41 }
 0x21b   : > { %v1463_v63 = vadd.f32 %v1449_v55, %v1437_v61 }
 0x21c   : > { %v1466_v0 = vmax.f32 %v1462_v62, 0.0  ;;  %v1427_v53 = vrot.slane %v3790_v43, %v1426_v50  ;;  %v1453_v55 = vrot.slane %v3797_v45, %v1426_v50  ;;  %v2991_v43 = vld [vmem:[#allocation11 + $0x70] sm:$0xff]   ;;  %v2993_v45 = vld [vmem:[#allocation11 + $0x78] sm:$0xff]  }
 0x21d   : > { %v1467_v1 = vmax.f32 %v1463_v63, 0.0 }
 0x21e   : > { %v1470_v2 = vpack.c.bf16 %v1466_v0, %v1466_v0 }
 0x21f   : > { %v1471_v3 = vpack.c.bf16 %v1467_v1, %v1467_v1 }
 0x221   : > { %1890 = vmatprep.mubr.bf16.mxu0 %v1471_v3 }
 0x222   : > { %1891 = vmatmul.mubr.bf16.vlgmr.msra.gmra.mrb[4].mxu0 %v1470_v2 }
 0x223   : > { %1900 = vmatpush1.bf16.msra.mxu0 %v2931_v4  ;;  %v2990_v4 = vld [vmem:[#allocation11 + $0x28] sm:$0xff]  }
 0x224   : > { %1901 = vmatprep.subr.bf16.mxu0 %v2936_v7  ;;  %2555 = vmatpush3.bf16.msra.mxu1 %v2990_v4  ;;  %v2992_v7 = vld [vmem:[#allocation11 + $0x30] sm:$0xff]  }
 0x225   : > { %2556 = vmatprep.subr.bf16.mxu1 %v2991_v43 }
 0x227   : > { %1902 = vmatpush1.bf16.msra.mxu0 %v2934_v10  ;;  %v1945_v10 = vrot.slane %v1940_v5, %v3788_v42 }
 0x228   : > { %1903 = vmatprep.subr.bf16.mxu0 %v2939_v11  ;;  %2557 = vmatpush3.bf16.msra.mxu1 %v2992_v7  ;;  %v1959_v11 = vrot.slane %v1954_v9, %v3788_v42 }
 0x229   : > { %2558 = vmatprep.subr.bf16.mxu1 %v2993_v45 }
 0x22b   : > { %1904 = vmatpush1.bf16.msra.mxu0 %v2937_v13  ;;  %v1963_v13 = vrot.slane %v1954_v9, %v3793_v44 }
 0x22c   : > { %1905 = vmatprep.subr.bf16.mxu0 %v2942_v15  ;;  %2559 = vmatpush3.bf16.msra.mxu1 %v2994_v8 }
 0x22f   : > { %1906 = vmatpush1.bf16.msra.mxu0 %v2940_v17 }
 0x230   : > { %1907 = vmatprep.subr.bf16.mxu0 %v2945_v19 }
 0x233   : > { %1908 = vmatpush1.bf16.msra.mxu0 %v2943_v21 }
 0x234   : > { %1909 = vmatprep.subr.bf16.mxu0 %v2948_v23 }
 0x237   : > { %1910 = vmatpush1.bf16.msra.mxu0 %v2946_v25  ;;  %v2522_v25 = vld [vmem:[#allocation13] ss:$0 sm:$0xff] }
 0x238   : > { %1911 = vmatprep.subr.bf16.mxu0 %v2951_v26 }
 0x23b   : > { %1912 = vmatpush1.bf16.msra.mxu0 %v2949_v27 }
 0x23c   : > { %1913 = vmatprep.subr.bf16.mxu0 %v2954_v28 }
 0x23f   : > { %1914 = vmatpush1.bf16.msra.mxu0 %v2952_v29 }
 0x240   : > { %1915 = vmatprep.subr.bf16.mxu0 %v2957_v30 }
 0x243   : > { %1916 = vmatpush1.bf16.msra.mxu0 %v2955_v31 }
 0x244   : > { %1917 = vmatprep.subr.bf16.mxu0 %v2960_v32 }
 0x247   : > { %1918 = vmatpush1.bf16.msra.mxu0 %v2958_v33 }
 0x248   : > { %1919 = vmatprep.subr.bf16.mxu0 %v2963_v34 }
 0x24b   : > { %1920 = vmatpush1.bf16.msra.mxu0 %v2961_v35 }
 0x24c   : > { %1921 = vmatprep.subr.bf16.mxu0 %v2966_v36 }
 0x24f   : > { %1922 = vmatpush1.bf16.msra.mxu0 %v2964_v37 }
 0x250   : > { %1923 = vmatprep.subr.bf16.mxu0 %v2969_v38 }
 0x253   : > { %1924 = vmatpush1.bf16.msra.mxu0 %v2967_v39 }
 0x254   : > { %1925 = vmatprep.subr.bf16.mxu0 %v2972_v40 }
 0x257   : > { %1926 = vmatpush1.bf16.msra.mxu0 %v2970_v46 }
 0x258   : > { %1927 = vmatprep.subr.bf16.mxu0 %v2975_v47 }
 0x25b   : > { %1928 = vmatpush1.bf16.msra.mxu0 %v2973_v48 }
 0x25c   : > { %1929 = vmatprep.subr.bf16.mxu0 %v2978_v6 }
 0x25f   : > { %1930 = vmatpush1.bf16.msra.mxu0 %v2976_v49 }
 0x294   : > { %v1407_v56 = vpop.f32.mrb[4].mxu1 }
 0x295   : > { %v1438_v58 = vmul.f32 %v1427_v53, %v1407_v56  ;;  %v1409_v59 = vpop.f32.mrb[5].mxu1 }
 0x296   : > { %v1439_v60 = vmul.f32 %v1431_v54, %v1409_v59  ;;  %v1411_v61 = vpop.f32.mrb[6].mxu1 }
 0x297   : > { %v1464_v62 = vadd.f32 %v1453_v55, %v1438_v58  ;;  %v1412_v63 = vpop.f32.mrb[7].mxu1 }
 0x298   : > { %v1465_v0 = vadd.f32 %v1457_v57, %v1439_v60 }
 0x299   : > { %v1468_v1 = vmax.f32 %v1464_v62, 0.0 }
 0x29a   : > { %v1469_v2 = vmax.f32 %v1465_v0, 0.0 }
 0x29b   : > { %v1472_v41 = vpack.c.bf16 %v1468_v1, %v1468_v1 }
 0x29c   : > { %v1473_v3 = vpack.c.bf16 %v1469_v2, %v1469_v2 }
 0x29e   : > { %1931 = vmatprep.mubr.bf16.mxu0 %v1473_v3 }
 0x29f   : > { %1932 = vmatmul.mubr.bf16.vlgmr.msra.gmra.mrb[4].mxu0 %v1472_v41 }
 0x372   : > { %v1933_v12 = vpop.f32.mrb[4].mxu0 }
 0x373   : > { %v1952_v14 = vmul.f32 %v1945_v10, %v1933_v12  ;;  %v1935_v15 = vpop.f32.mrb[5].mxu0 }
 0x374   : > { %v1953_v16 = vmul.f32 %v1949_v51, %v1935_v15  ;;  %v1937_v17 = vpop.f32.mrb[6].mxu0 }
 0x375   : > { %v1966_v18 = vadd.f32 %v1959_v11, %v1952_v14  ;;  %v1938_v19 = vpop.f32.mrb[7].mxu0 }
 0x376   : > { %v1967_v20 = vadd.f32 %v1963_v13, %v1953_v16 }
 0x377   : > { %v1968_v21 = vmax.f32 %v1966_v18, 0.0 }
 0x378   : > { %v1969_v22 = vmax.f32 %v1967_v20, 0.0 }
 0x379   : > { %v1970_v24 = vpack.c.bf16 %v1968_v21, %v1968_v21 }
 0x37a   : > { %v1971_v23 = vpack.c.bf16 %v1969_v22, %v1969_v22 }
 0x37c   : > { %2139 = vmatprep.mubr.bf16.mxu1 %v1971_v23 }
 0x37d   : > { %2140 = vmatmul.mubr.bf16.vlgmr.msra.gmra.mrb[8].mxu1 %v1970_v24 }
 0x450   : > { %v2560_v42 = vpop.f32.mrb[8].mxu1  ;;  %2151 = sbr.rel (%p2539_p11) target bundleno = 1139 (0x473), region = 92 }
 0x451   : > { %v2561_v26 = vpop.f32.mrb[9].mxu1 }
 0x452   : > { %v2562_v44 = vadd.f32 %v2561_v26, %v2560_v42  ;;  %v2563_v27 = vpop.f32.mrb[10].mxu1 }
 0x453   : > { %v2564_v28 = vpop.f32.mrb[11].mxu1 }
 0x454   : > { %v2142_v29 = vadd.f32 %v2562_v44, %v2522_v25 }
 0x456   : > { %2147 = vst [vmem:[%s464_s7] sm:$0xff] %v2142_v29  ;;  %v2152_v30 = vsub.f32 (!%p2539_p11), 0.0, %v2142_v29 }
 0x458   : > { %v2153_v31 = vmul.f32 1.442695, %v2152_v30 }
 0x45a   : > { %2995 = vpow2.f32 %v2153_v31 }
 0x464   : > { %v2996_v32 = vpop.eup %2995 }
 0x465   : > { %v2155_v33 = vadd.f32 1.0, %v2996_v32 }
 0x467   : > { %2997 = vrcp.f32 %v2155_v33 }
 0x471   : > { %v2998_v34 = vpop.eup %2997 }
 0x472   : > { %2158 = vst [vmem:[%s464_s7] sm:$0xff] %v2998_v34 }
 0x473 PF: > { %s3890_s12 = sld [smem:[#allocation20_spill]]  ;;  %s3891_s20 = sld [smem:[#allocation21_spill]] }
 0x474   : > { %s3892_s30 = smov %s3273_s10  ;;  %s3893_s10 = smov %s3277_s11 }
 0x479   : > { %p22_p3 = scmp.ge.s32.totalorder %s3890_s12, 6   ;;  %s3894_s11 = smov %s3891_s20 }
 0x47b   :  { %24 = sbr.rel (!%p22_p3) target bundleno = 12 (0xc), region = 135 }
 0x482   :  { %2178 = vsyncpa [#allocation3], 1 }
 0x483   :  { %2180 = vsyncpa [#allocation3 + $0x1], 1 }
 0x484   :  { %2181 = vsyncpa [#allocation5], 1 }
 0x485   :  { %2182 = vsyncpa [#allocation9], 1 }
 0x486   :  { %2183 = vsyncpa [#allocation12], 1 }

</bundles_post_ra>
